<compile_context>
chip_gen: v7x
topology: tpu7x:2x2x1
jax: 0.10.0
libtpu: 0.0.40
codegen_flags: <defaults>
</compile_context>

<pallas_src>
import functools

import jax
import jax.numpy as jnp
from jax import lax
from jax.experimental import pallas as pl
from jax.experimental.pallas import tpu as pltpu


def _round_up(x, m):
    return (x + m - 1) // m * m


# ----------------------------------------------------------------------------
# Pallas kernels
# ----------------------------------------------------------------------------
def _accumulate_conv(x_row_refs, w_ref, shift_ref, width):
    """Implicit-GEMM 3x3 conv for one output row, starting from the folded-BN
    shift.  Returns a (width, Cp) f32 accumulator."""
    cp = w_ref.shape[-1]
    acc = jnp.broadcast_to(shift_ref[...], (width, cp)).astype(jnp.float32)
    for kh, xr in enumerate(x_row_refs):
        row = xr[0, 0]                                   # (W+2, Cp) bf16
        for kw in range(3):
            acc = acc + jnp.dot(row[kw:kw + width, :], w_ref[kh, kw],
                                preferred_element_type=jnp.float32)
    return acc


def conv_bn_prelu_kernel(x0_ref, x1_ref, x2_ref, w_ref, shift_ref, alpha_ref,
                         o_ref, *, width):
    """Conv3x3 + folded BatchNorm + PReLU, one output row per grid step."""
    acc = _accumulate_conv((x0_ref, x1_ref, x2_ref), w_ref, shift_ref, width)
    y = jnp.where(acc >= 0.0, acc, alpha_ref[...] * acc)        # PReLU
    o_ref[0, 0] = y.astype(o_ref.dtype)


def conv_bn_residual_kernel(x0_ref, x1_ref, x2_ref, w_ref, shift_ref, res_ref,
                            o_ref, *, width):
    """Conv3x3 + folded BatchNorm + residual add, one output row per grid step."""
    acc = _accumulate_conv((x0_ref, x1_ref, x2_ref), w_ref, shift_ref, width)
    o_ref[0, 0] = (acc + res_ref[0, 0].astype(jnp.float32)).astype(o_ref.dtype)


# ----------------------------------------------------------------------------
# pallas_call wrapper
# ----------------------------------------------------------------------------
def fused_conv3x3(x_pad, w, shift, extra, *, residual, out_dtype):
    """x_pad: (N, H+2, W+2, Cp) bf16 (spatial halo + channel padding).
    w: (3, 3, Cp, Cp) bf16 with the BN scale already folded in.
    shift: (1, Cp) f32.
    extra: PReLU alpha (1, Cp) f32 if residual=False, else the residual
           tensor (N, H, W, Cp) f32."""
    n, hp, wp, cp = x_pad.shape
    h, wd = hp - 2, wp - 2

    if residual:
        kernel = conv_bn_residual_kernel
        extra_spec = pl.BlockSpec((1, 1, wd, cp), lambda ni, hi: (ni, hi, 0, 0))
    else:
        kernel = conv_bn_prelu_kernel
        extra_spec = pl.BlockSpec((1, cp), lambda ni, hi: (0, 0))

    return pl.pallas_call(
        functools.partial(kernel, width=wd),
        out_shape=jax.ShapeDtypeStruct((n, h, wd, cp), out_dtype),
        grid_spec=pltpu.PrefetchScalarGridSpec(
            num_scalar_prefetch=0,
            grid=(n, h),
            in_specs=[
                # Three row-shifted views of the same padded activation: the
                # H block size is 1, so block indices are element offsets.
                pl.BlockSpec((1, 1, wp, cp), lambda ni, hi: (ni, hi, 0, 0)),
                pl.BlockSpec((1, 1, wp, cp), lambda ni, hi: (ni, hi + 1, 0, 0)),
                pl.BlockSpec((1, 1, wp, cp), lambda ni, hi: (ni, hi + 2, 0, 0)),
                # Whole 3x3 weight stays VMEM-resident (constant index map).
                pl.BlockSpec((3, 3, cp, cp), lambda ni, hi: (0, 0, 0, 0)),
                pl.BlockSpec((1, cp), lambda ni, hi: (0, 0)),
                extra_spec,
            ],
            out_specs=pl.BlockSpec((1, 1, wd, cp), lambda ni, hi: (ni, hi, 0, 0)),
        ),
        compiler_params=pltpu.CompilerParams(
            dimension_semantics=("parallel", "parallel")),
    )(x_pad, x_pad, x_pad, w, shift, extra)


# ----------------------------------------------------------------------------
# Deterministic parameter construction (synthetic, matches module shapes)
# ----------------------------------------------------------------------------
def init_params(key, channels):
    kw1, kbn1, kw2, kbn2 = jax.random.split(key, 4)

    def conv_w(k, c):
        return jax.random.normal(k, (3, 3, c, c), jnp.float32) / jnp.sqrt(9.0 * c)

    def bn_params(k, c):
        kg, kb, km, kv = jax.random.split(k, 4)
        gamma = 1.0 + 0.1 * jax.random.normal(kg, (c,), jnp.float32)
        beta = 0.1 * jax.random.normal(kb, (c,), jnp.float32)
        rmean = 0.05 * jax.random.normal(km, (c,), jnp.float32)
        rvar = 1.0 + 0.1 * jax.random.uniform(kv, (c,), jnp.float32)
        return (gamma, beta, rmean, rvar)

    return dict(
        w1=conv_w(kw1, channels), bn1=bn_params(kbn1, channels),
        alpha=jnp.float32(0.25),                      # nn.PReLU() default init
        w2=conv_w(kw2, channels), bn2=bn_params(kbn2, channels),
    )


def _fold_bn(w, bn):
    gamma, beta, rmean, rvar = bn
    scale = gamma / jnp.sqrt(rvar + 1e-5)
    shift = beta - rmean * scale
    return w * scale[None, None, None, :], shift


def prepare_kernel_params(params, cp):
    """Fold BN scale into the conv weights, pad channels to cp, cast to bf16."""
    c = params["w1"].shape[-1]

    def pad_w(w):
        return jnp.pad(w, ((0, 0), (0, 0), (0, cp - c), (0, cp - c))
                       ).astype(jnp.bfloat16)

    def pad_vec(v):
        return jnp.pad(v, ((0, cp - c),)).reshape(1, cp).astype(jnp.float32)

    w1, s1 = _fold_bn(params["w1"], params["bn1"])
    w2, s2 = _fold_bn(params["w2"], params["bn2"])
    alpha = jnp.full((1, cp), params["alpha"], jnp.float32)
    return dict(w1=pad_w(w1), shift1=pad_vec(s1),
                w2=pad_w(w2), shift2=pad_vec(s2), alpha=alpha)


# ----------------------------------------------------------------------------
# Forward pass (Pallas) and pure-JAX reference
# ----------------------------------------------------------------------------
def make_forward(params, channels):
    cp = max(128, _round_up(channels, 128))           # lane-dense channels
    kp = prepare_kernel_params(params, cp)

    def forward(x_nchw):
        x = jnp.transpose(x_nchw, (0, 2, 3, 1)).astype(jnp.float32)   # NHWC
        c = x.shape[-1]
        x_cp = jnp.pad(x, ((0, 0), (0, 0), (0, 0), (0, cp - c)))      # f32 (residual)
        x_pad = jnp.pad(x_cp, ((0, 0), (1, 1), (1, 1), (0, 0))
                        ).astype(jnp.bfloat16)
        h1 = fused_conv3x3(x_pad, kp["w1"], kp["shift1"], kp["alpha"],
                           residual=False, out_dtype=jnp.bfloat16)
        h1_pad = jnp.pad(h1, ((0, 0), (1, 1), (1, 1), (0, 0)))
        out = fused_conv3x3(h1_pad, kp["w2"], kp["shift2"], x_cp,
                            residual=True, out_dtype=jnp.float32)
        out = out[..., :c]
        return jnp.transpose(out, (0, 3, 1, 2))                       # NCHW
    return jax.jit(forward)


def ref_forward(x_nchw, params):
    x = jnp.transpose(x_nchw, (0, 2, 3, 1)).astype(jnp.float32)

    def conv(y, w):
        return lax.conv_general_dilated(
            y, w, window_strides=(1, 1), padding=((1, 1), (1, 1)),
            dimension_numbers=("NHWC", "HWIO", "NHWC"),
            precision=lax.Precision.HIGHEST)

    def bn(y, p):
        gamma, beta, rmean, rvar = p
        return (y - rmean) * (gamma / jnp.sqrt(rvar + 1e-5)) + beta

    y = bn(conv(x, params["w1"]), params["bn1"])
    y = jnp.where(y >= 0, y, params["alpha"] * y)                     # PReLU
    y = bn(conv(y, params["w2"]), params["bn2"])
    out = y + x                                                       # residual
    return jnp.transpose(out, (0, 3, 1, 2))


if __name__ == "__main__":
    key = jax.random.PRNGKey(0)
    batch, channels, size = 2, 64, 16

    params = init_params(key, channels)
    forward = make_forward(params, channels)

    x = jax.random.normal(jax.random.fold_in(key, 7),
                          (batch, channels, size, size), jnp.float32)  # NCHW
    y = jax.block_until_ready(forward(x))

    assert y.shape == (batch, channels, size, size), y.shape
    assert bool(jnp.all(jnp.isfinite(y)))

    ref = ref_forward(x, params)
    err = float(jnp.max(jnp.abs(y - ref)))
    assert err < 1e-1, f"max abs err {err}"

    print("KERNEL_OK")
</pallas_src>

<mosaic_0001>
module attributes {stable_mosaic.version = 11 : i64} {
  func.func @conv_bn_prelu_kernel(%arg0: i32, %arg1: i32, %arg2: memref<1x1x18x128xbf16, #tpu.memory_space<vmem>>, %arg3: memref<1x1x18x128xbf16, #tpu.memory_space<vmem>>, %arg4: memref<1x1x18x128xbf16, #tpu.memory_space<vmem>>, %arg5: memref<3x3x128x128xbf16, #tpu.memory_space<vmem>>, %arg6: memref<1x128xf32, #tpu.memory_space<vmem>>, %arg7: memref<1x128xf32, #tpu.memory_space<vmem>>, %arg8: memref<1x1x16x128xbf16, #tpu.memory_space<vmem>>) attributes {dimension_semantics = [#tpu.dimension_semantics<parallel>, #tpu.dimension_semantics<parallel>], iteration_bounds = array<i64: 2, 16>, scalar_prefetch = 0 : i64, scratch_operands = 0 : i64, tpu.core_type = #tpu.core_type<tc>, window_params = [{transform_indices = @transform_0, window_bounds = array<i64: 1, 1, 18, 128>}, {transform_indices = @transform_1, window_bounds = array<i64: 1, 1, 18, 128>}, {transform_indices = @transform_2, window_bounds = array<i64: 1, 1, 18, 128>}, {pipeline_mode = #tpu.pipeline_mode<synchronous>, transform_indices = @transform_3, window_bounds = array<i64: 3, 3, 128, 128>}, {pipeline_mode = #tpu.pipeline_mode<synchronous>, transform_indices = @transform_4, window_bounds = array<i64: 1, 128>}, {pipeline_mode = #tpu.pipeline_mode<synchronous>, transform_indices = @transform_5, window_bounds = array<i64: 1, 128>}, {transform_indices = @transform_6, window_bounds = array<i64: 1, 1, 16, 128>}]} {
    %c0 = arith.constant 0 : index
    %c0_0 = arith.constant 0 : index
    %0 = vector.load %arg6[%c0, %c0_0] : memref<1x128xf32, #tpu.memory_space<vmem>>, vector<1x128xf32>
    %1 = vector.shape_cast %0 : vector<1x128xf32> to vector<1x128xf32>
    %2 = vector.broadcast %1 : vector<1x128xf32> to vector<16x128xf32>
    %c0_1 = arith.constant 0 : index
    %c0_2 = arith.constant 0 : index
    %c0_3 = arith.constant 0 : index
    %c0_4 = arith.constant 0 : index
    %3 = vector.load %arg2[%c0_1, %c0_2, %c0_3, %c0_4] : memref<1x1x18x128xbf16, #tpu.memory_space<vmem>>, vector<1x1x18x128xbf16>
    %4 = vector.shape_cast %3 : vector<1x1x18x128xbf16> to vector<18x128xbf16>
    %5 = vector.extract_strided_slice %4 {offsets = [0, 0], sizes = [16, 128], strides = [1, 1]} : vector<18x128xbf16> to vector<16x128xbf16>
    %c0_5 = arith.constant 0 : index
    %c0_6 = arith.constant 0 : index
    %c0_7 = arith.constant 0 : index
    %c0_8 = arith.constant 0 : index
    %6 = vector.load %arg5[%c0_5, %c0_6, %c0_7, %c0_8] : memref<3x3x128x128xbf16, #tpu.memory_space<vmem>>, vector<1x1x128x128xbf16>
    %7 = vector.shape_cast %6 : vector<1x1x128x128xbf16> to vector<128x128xbf16>
    %cst = arith.constant dense<0.000000e+00> : vector<16x128xf32>
    %8 = tpu.matmul %5, %7, %cst {dimension_numbers = #tpu.dot_dimension_numbers<[1], [0], [0], [1], [0, 0, 1, 1], [], []>} : vector<16x128xbf16>, vector<128x128xbf16>, vector<16x128xf32> -> vector<16x128xf32>
    %9 = arith.addf %2, %8 : vector<16x128xf32>
    %10 = vector.extract_strided_slice %4 {offsets = [1, 0], sizes = [16, 128], strides = [1, 1]} : vector<18x128xbf16> to vector<16x128xbf16>
    %c0_9 = arith.constant 0 : index
    %c1 = arith.constant 1 : index
    %c0_10 = arith.constant 0 : index
    %c0_11 = arith.constant 0 : index
    %11 = vector.load %arg5[%c0_9, %c1, %c0_10, %c0_11] : memref<3x3x128x128xbf16, #tpu.memory_space<vmem>>, vector<1x1x128x128xbf16>
    %12 = vector.shape_cast %11 : vector<1x1x128x128xbf16> to vector<128x128xbf16>
    %cst_12 = arith.constant dense<0.000000e+00> : vector<16x128xf32>
    %13 = tpu.matmul %10, %12, %cst_12 {dimension_numbers = #tpu.dot_dimension_numbers<[1], [0], [0], [1], [0, 0, 1, 1], [], []>} : vector<16x128xbf16>, vector<128x128xbf16>, vector<16x128xf32> -> vector<16x128xf32>
    %14 = arith.addf %9, %13 : vector<16x128xf32>
    %15 = vector.extract_strided_slice %4 {offsets = [2, 0], sizes = [16, 128], strides = [1, 1]} : vector<18x128xbf16> to vector<16x128xbf16>
    %c0_13 = arith.constant 0 : index
    %c2 = arith.constant 2 : index
    %c0_14 = arith.constant 0 : index
    %c0_15 = arith.constant 0 : index
    %16 = vector.load %arg5[%c0_13, %c2, %c0_14, %c0_15] : memref<3x3x128x128xbf16, #tpu.memory_space<vmem>>, vector<1x1x128x128xbf16>
    %17 = vector.shape_cast %16 : vector<1x1x128x128xbf16> to vector<128x128xbf16>
    %cst_16 = arith.constant dense<0.000000e+00> : vector<16x128xf32>
    %18 = tpu.matmul %15, %17, %cst_16 {dimension_numbers = #tpu.dot_dimension_numbers<[1], [0], [0], [1], [0, 0, 1, 1], [], []>} : vector<16x128xbf16>, vector<128x128xbf16>, vector<16x128xf32> -> vector<16x128xf32>
    %19 = arith.addf %14, %18 : vector<16x128xf32>
    %c0_17 = arith.constant 0 : index
    %c0_18 = arith.constant 0 : index
    %c0_19 = arith.constant 0 : index
    %c0_20 = arith.constant 0 : index
    %20 = vector.load %arg3[%c0_17, %c0_18, %c0_19, %c0_20] : memref<1x1x18x128xbf16, #tpu.memory_space<vmem>>, vector<1x1x18x128xbf16>
    %21 = vector.shape_cast %20 : vector<1x1x18x128xbf16> to vector<18x128xbf16>
    %22 = vector.extract_strided_slice %21 {offsets = [0, 0], sizes = [16, 128], strides = [1, 1]} : vector<18x128xbf16> to vector<16x128xbf16>
    %c1_21 = arith.constant 1 : index
    %c0_22 = arith.constant 0 : index
    %c0_23 = arith.constant 0 : index
    %c0_24 = arith.constant 0 : index
    %23 = vector.load %arg5[%c1_21, %c0_22, %c0_23, %c0_24] : memref<3x3x128x128xbf16, #tpu.memory_space<vmem>>, vector<1x1x128x128xbf16>
    %24 = vector.shape_cast %23 : vector<1x1x128x128xbf16> to vector<128x128xbf16>
    %cst_25 = arith.constant dense<0.000000e+00> : vector<16x128xf32>
    %25 = tpu.matmul %22, %24, %cst_25 {dimension_numbers = #tpu.dot_dimension_numbers<[1], [0], [0], [1], [0, 0, 1, 1], [], []>} : vector<16x128xbf16>, vector<128x128xbf16>, vector<16x128xf32> -> vector<16x128xf32>
    %26 = arith.addf %19, %25 : vector<16x128xf32>
    %27 = vector.extract_strided_slice %21 {offsets = [1, 0], sizes = [16, 128], strides = [1, 1]} : vector<18x128xbf16> to vector<16x128xbf16>
    %c1_26 = arith.constant 1 : index
    %c1_27 = arith.constant 1 : index
    %c0_28 = arith.constant 0 : index
    %c0_29 = arith.constant 0 : index
    %28 = vector.load %arg5[%c1_26, %c1_27, %c0_28, %c0_29] : memref<3x3x128x128xbf16, #tpu.memory_space<vmem>>, vector<1x1x128x128xbf16>
    %29 = vector.shape_cast %28 : vector<1x1x128x128xbf16> to vector<128x128xbf16>
    %cst_30 = arith.constant dense<0.000000e+00> : vector<16x128xf32>
    %30 = tpu.matmul %27, %29, %cst_30 {dimension_numbers = #tpu.dot_dimension_numbers<[1], [0], [0], [1], [0, 0, 1, 1], [], []>} : vector<16x128xbf16>, vector<128x128xbf16>, vector<16x128xf32> -> vector<16x128xf32>
    %31 = arith.addf %26, %30 : vector<16x128xf32>
    %32 = vector.extract_strided_slice %21 {offsets = [2, 0], sizes = [16, 128], strides = [1, 1]} : vector<18x128xbf16> to vector<16x128xbf16>
    %c1_31 = arith.constant 1 : index
    %c2_32 = arith.constant 2 : index
    %c0_33 = arith.constant 0 : index
    %c0_34 = arith.constant 0 : index
    %33 = vector.load %arg5[%c1_31, %c2_32, %c0_33, %c0_34] : memref<3x3x128x128xbf16, #tpu.memory_space<vmem>>, vector<1x1x128x128xbf16>
    %34 = vector.shape_cast %33 : vector<1x1x128x128xbf16> to vector<128x128xbf16>
    %cst_35 = arith.constant dense<0.000000e+00> : vector<16x128xf32>
    %35 = tpu.matmul %32, %34, %cst_35 {dimension_numbers = #tpu.dot_dimension_numbers<[1], [0], [0], [1], [0, 0, 1, 1], [], []>} : vector<16x128xbf16>, vector<128x128xbf16>, vector<16x128xf32> -> vector<16x128xf32>
    %36 = arith.addf %31, %35 : vector<16x128xf32>
    %c0_36 = arith.constant 0 : index
    %c0_37 = arith.constant 0 : index
    %c0_38 = arith.constant 0 : index
    %c0_39 = arith.constant 0 : index
    %37 = vector.load %arg4[%c0_36, %c0_37, %c0_38, %c0_39] : memref<1x1x18x128xbf16, #tpu.memory_space<vmem>>, vector<1x1x18x128xbf16>
    %38 = vector.shape_cast %37 : vector<1x1x18x128xbf16> to vector<18x128xbf16>
    %39 = vector.extract_strided_slice %38 {offsets = [0, 0], sizes = [16, 128], strides = [1, 1]} : vector<18x128xbf16> to vector<16x128xbf16>
    %c2_40 = arith.constant 2 : index
    %c0_41 = arith.constant 0 : index
    %c0_42 = arith.constant 0 : index
    %c0_43 = arith.constant 0 : index
    %40 = vector.load %arg5[%c2_40, %c0_41, %c0_42, %c0_43] : memref<3x3x128x128xbf16, #tpu.memory_space<vmem>>, vector<1x1x128x128xbf16>
    %41 = vector.shape_cast %40 : vector<1x1x128x128xbf16> to vector<128x128xbf16>
    %cst_44 = arith.constant dense<0.000000e+00> : vector<16x128xf32>
    %42 = tpu.matmul %39, %41, %cst_44 {dimension_numbers = #tpu.dot_dimension_numbers<[1], [0], [0], [1], [0, 0, 1, 1], [], []>} : vector<16x128xbf16>, vector<128x128xbf16>, vector<16x128xf32> -> vector<16x128xf32>
    %43 = arith.addf %36, %42 : vector<16x128xf32>
    %44 = vector.extract_strided_slice %38 {offsets = [1, 0], sizes = [16, 128], strides = [1, 1]} : vector<18x128xbf16> to vector<16x128xbf16>
    %c2_45 = arith.constant 2 : index
    %c1_46 = arith.constant 1 : index
    %c0_47 = arith.constant 0 : index
    %c0_48 = arith.constant 0 : index
    %45 = vector.load %arg5[%c2_45, %c1_46, %c0_47, %c0_48] : memref<3x3x128x128xbf16, #tpu.memory_space<vmem>>, vector<1x1x128x128xbf16>
    %46 = vector.shape_cast %45 : vector<1x1x128x128xbf16> to vector<128x128xbf16>
    %cst_49 = arith.constant dense<0.000000e+00> : vector<16x128xf32>
    %47 = tpu.matmul %44, %46, %cst_49 {dimension_numbers = #tpu.dot_dimension_numbers<[1], [0], [0], [1], [0, 0, 1, 1], [], []>} : vector<16x128xbf16>, vector<128x128xbf16>, vector<16x128xf32> -> vector<16x128xf32>
    %48 = arith.addf %43, %47 : vector<16x128xf32>
    %49 = vector.extract_strided_slice %38 {offsets = [2, 0], sizes = [16, 128], strides = [1, 1]} : vector<18x128xbf16> to vector<16x128xbf16>
    %c2_50 = arith.constant 2 : index
    %c2_51 = arith.constant 2 : index
    %c0_52 = arith.constant 0 : index
    %c0_53 = arith.constant 0 : index
    %50 = vector.load %arg5[%c2_50, %c2_51, %c0_52, %c0_53] : memref<3x3x128x128xbf16, #tpu.memory_space<vmem>>, vector<1x1x128x128xbf16>
    %51 = vector.shape_cast %50 : vector<1x1x128x128xbf16> to vector<128x128xbf16>
    %cst_54 = arith.constant dense<0.000000e+00> : vector<16x128xf32>
    %52 = tpu.matmul %49, %51, %cst_54 {dimension_numbers = #tpu.dot_dimension_numbers<[1], [0], [0], [1], [0, 0, 1, 1], [], []>} : vector<16x128xbf16>, vector<128x128xbf16>, vector<16x128xf32> -> vector<16x128xf32>
    %53 = arith.addf %48, %52 : vector<16x128xf32>
    %cst_55 = arith.constant 0.000000e+00 : f32
    %54 = vector.broadcast %cst_55 : f32 to vector<16x128xf32>
    %55 = arith.cmpf oge, %53, %54 : vector<16x128xf32>
    %c0_56 = arith.constant 0 : index
    %c0_57 = arith.constant 0 : index
    %56 = vector.load %arg7[%c0_56, %c0_57] : memref<1x128xf32, #tpu.memory_space<vmem>>, vector<1x128xf32>
    %57 = vector.broadcast %56 : vector<1x128xf32> to vector<16x128xf32>
    %58 = arith.mulf %57, %53 : vector<16x128xf32>
    %59 = arith.select %55, %53, %58 : vector<16x128xi1>, vector<16x128xf32>
    %60 = arith.truncf %59 : vector<16x128xf32> to vector<16x128xbf16>
    %c0_58 = arith.constant 0 : index
    %c0_59 = arith.constant 0 : index
    %c0_60 = arith.constant 0 : index
    %c0_61 = arith.constant 0 : index
    %61 = vector.load %arg8[%c0_58, %c0_59, %c0_60, %c0_61] : memref<1x1x16x128xbf16, #tpu.memory_space<vmem>>, vector<1x1x16x128xbf16>
    %62 = vector.shape_cast %61 : vector<1x1x16x128xbf16> to vector<16x128xbf16>
    %63 = vector.shape_cast %60 : vector<16x128xbf16> to vector<1x1x16x128xbf16>
    tpu.vector_store %arg8[%c0_58, %c0_59, %c0_60, %c0_61], %63 {strides = array<i32>} : memref<1x1x16x128xbf16, #tpu.memory_space<vmem>>, vector<1x1x16x128xbf16>,
    return
  }
  func.func @transform_0(%arg0: i32, %arg1: i32) -> (i32, i32, i32, i32) {
    %c0_i32 = arith.constant 0 : i32
    %c0_i32_0 = arith.constant 0 : i32
    %c0_i32_1 = arith.constant 0 : i32
    return %arg0, %arg1, %c0_i32, %c0_i32_0 : i32, i32, i32, i32
  }
  func.func @transform_1(%arg0: i32, %arg1: i32) -> (i32, i32, i32, i32) {
    %c1_i32 = arith.constant 1 : i32
    %0 = arith.addi %arg1, %c1_i32 : i32
    %c0_i32 = arith.constant 0 : i32
    %c0_i32_0 = arith.constant 0 : i32
    %c0_i32_1 = arith.constant 0 : i32
    return %arg0, %0, %c0_i32, %c0_i32_0 : i32, i32, i32, i32
  }
  func.func @transform_2(%arg0: i32, %arg1: i32) -> (i32, i32, i32, i32) {
    %c2_i32 = arith.constant 2 : i32
    %0 = arith.addi %arg1, %c2_i32 : i32
    %c0_i32 = arith.constant 0 : i32
    %c0_i32_0 = arith.constant 0 : i32
    %c0_i32_1 = arith.constant 0 : i32
    return %arg0, %0, %c0_i32, %c0_i32_0 : i32, i32, i32, i32
  }
  func.func @transform_3(%arg0: i32, %arg1: i32) -> (i32, i32, i32, i32) {
    %c0_i32 = arith.constant 0 : i32
    %c0_i32_0 = arith.constant 0 : i32
    %c0_i32_1 = arith.constant 0 : i32
    %c0_i32_2 = arith.constant 0 : i32
    %c0_i32_3 = arith.constant 0 : i32
    return %c0_i32, %c0_i32_0, %c0_i32_1, %c0_i32_2 : i32, i32, i32, i32
  }
  func.func @transform_4(%arg0: i32, %arg1: i32) -> (i32, i32) {
    %c0_i32 = arith.constant 0 : i32
    %c0_i32_0 = arith.constant 0 : i32
    %c0_i32_1 = arith.constant 0 : i32
    return %c0_i32, %c0_i32_0 : i32, i32
  }
  func.func @transform_5(%arg0: i32, %arg1: i32) -> (i32, i32) {
    %c0_i32 = arith.constant 0 : i32
    %c0_i32_0 = arith.constant 0 : i32
    %c0_i32_1 = arith.constant 0 : i32
    return %c0_i32, %c0_i32_0 : i32, i32
  }
  func.func @transform_6(%arg0: i32, %arg1: i32) -> (i32, i32, i32, i32) {
    %c0_i32 = arith.constant 0 : i32
    %c0_i32_0 = arith.constant 0 : i32
    %c0_i32_1 = arith.constant 0 : i32
    return %arg0, %arg1, %c0_i32, %c0_i32_0 : i32, i32, i32, i32
  }
}

module attributes {stable_mosaic.version = 11 : i64} {
  func.func @conv_bn_residual_kernel(%arg0: i32, %arg1: i32, %arg2: memref<1x1x18x128xbf16, #tpu.memory_space<vmem>>, %arg3: memref<1x1x18x128xbf16, #tpu.memory_space<vmem>>, %arg4: memref<1x1x18x128xbf16, #tpu.memory_space<vmem>>, %arg5: memref<3x3x128x128xbf16, #tpu.memory_space<vmem>>, %arg6: memref<1x128xf32, #tpu.memory_space<vmem>>, %arg7: memref<1x1x16x128xf32, #tpu.memory_space<vmem>>, %arg8: memref<1x1x16x128xf32, #tpu.memory_space<vmem>>) attributes {dimension_semantics = [#tpu.dimension_semantics<parallel>, #tpu.dimension_semantics<parallel>], iteration_bounds = array<i64: 2, 16>, scalar_prefetch = 0 : i64, scratch_operands = 0 : i64, tpu.core_type = #tpu.core_type<tc>, window_params = [{transform_indices = @transform_0, window_bounds = array<i64: 1, 1, 18, 128>}, {transform_indices = @transform_1, window_bounds = array<i64: 1, 1, 18, 128>}, {transform_indices = @transform_2, window_bounds = array<i64: 1, 1, 18, 128>}, {pipeline_mode = #tpu.pipeline_mode<synchronous>, transform_indices = @transform_3, window_bounds = array<i64: 3, 3, 128, 128>}, {pipeline_mode = #tpu.pipeline_mode<synchronous>, transform_indices = @transform_4, window_bounds = array<i64: 1, 128>}, {transform_indices = @transform_5, window_bounds = array<i64: 1, 1, 16, 128>}, {transform_indices = @transform_6, window_bounds = array<i64: 1, 1, 16, 128>}]} {
    %c0 = arith.constant 0 : index
    %c0_0 = arith.constant 0 : index
    %0 = vector.load %arg6[%c0, %c0_0] : memref<1x128xf32, #tpu.memory_space<vmem>>, vector<1x128xf32>
    %1 = vector.shape_cast %0 : vector<1x128xf32> to vector<1x128xf32>
    %2 = vector.broadcast %1 : vector<1x128xf32> to vector<16x128xf32>
    %c0_1 = arith.constant 0 : index
    %c0_2 = arith.constant 0 : index
    %c0_3 = arith.constant 0 : index
    %c0_4 = arith.constant 0 : index
    %3 = vector.load %arg2[%c0_1, %c0_2, %c0_3, %c0_4] : memref<1x1x18x128xbf16, #tpu.memory_space<vmem>>, vector<1x1x18x128xbf16>
    %4 = vector.shape_cast %3 : vector<1x1x18x128xbf16> to vector<18x128xbf16>
    %5 = vector.extract_strided_slice %4 {offsets = [0, 0], sizes = [16, 128], strides = [1, 1]} : vector<18x128xbf16> to vector<16x128xbf16>
    %c0_5 = arith.constant 0 : index
    %c0_6 = arith.constant 0 : index
    %c0_7 = arith.constant 0 : index
    %c0_8 = arith.constant 0 : index
    %6 = vector.load %arg5[%c0_5, %c0_6, %c0_7, %c0_8] : memref<3x3x128x128xbf16, #tpu.memory_space<vmem>>, vector<1x1x128x128xbf16>
    %7 = vector.shape_cast %6 : vector<1x1x128x128xbf16> to vector<128x128xbf16>
    %cst = arith.constant dense<0.000000e+00> : vector<16x128xf32>
    %8 = tpu.matmul %5, %7, %cst {dimension_numbers = #tpu.dot_dimension_numbers<[1], [0], [0], [1], [0, 0, 1, 1], [], []>} : vector<16x128xbf16>, vector<128x128xbf16>, vector<16x128xf32> -> vector<16x128xf32>
    %9 = arith.addf %2, %8 : vector<16x128xf32>
    %10 = vector.extract_strided_slice %4 {offsets = [1, 0], sizes = [16, 128], strides = [1, 1]} : vector<18x128xbf16> to vector<16x128xbf16>
    %c0_9 = arith.constant 0 : index
    %c1 = arith.constant 1 : index
    %c0_10 = arith.constant 0 : index
    %c0_11 = arith.constant 0 : index
    %11 = vector.load %arg5[%c0_9, %c1, %c0_10, %c0_11] : memref<3x3x128x128xbf16, #tpu.memory_space<vmem>>, vector<1x1x128x128xbf16>
    %12 = vector.shape_cast %11 : vector<1x1x128x128xbf16> to vector<128x128xbf16>
    %cst_12 = arith.constant dense<0.000000e+00> : vector<16x128xf32>
    %13 = tpu.matmul %10, %12, %cst_12 {dimension_numbers = #tpu.dot_dimension_numbers<[1], [0], [0], [1], [0, 0, 1, 1], [], []>} : vector<16x128xbf16>, vector<128x128xbf16>, vector<16x128xf32> -> vector<16x128xf32>
    %14 = arith.addf %9, %13 : vector<16x128xf32>
    %15 = vector.extract_strided_slice %4 {offsets = [2, 0], sizes = [16, 128], strides = [1, 1]} : vector<18x128xbf16> to vector<16x128xbf16>
    %c0_13 = arith.constant 0 : index
    %c2 = arith.constant 2 : index
    %c0_14 = arith.constant 0 : index
    %c0_15 = arith.constant 0 : index
    %16 = vector.load %arg5[%c0_13, %c2, %c0_14, %c0_15] : memref<3x3x128x128xbf16, #tpu.memory_space<vmem>>, vector<1x1x128x128xbf16>
    %17 = vector.shape_cast %16 : vector<1x1x128x128xbf16> to vector<128x128xbf16>
    %cst_16 = arith.constant dense<0.000000e+00> : vector<16x128xf32>
    %18 = tpu.matmul %15, %17, %cst_16 {dimension_numbers = #tpu.dot_dimension_numbers<[1], [0], [0], [1], [0, 0, 1, 1], [], []>} : vector<16x128xbf16>, vector<128x128xbf16>, vector<16x128xf32> -> vector<16x128xf32>
    %19 = arith.addf %14, %18 : vector<16x128xf32>
    %c0_17 = arith.constant 0 : index
    %c0_18 = arith.constant 0 : index
    %c0_19 = arith.constant 0 : index
    %c0_20 = arith.constant 0 : index
    %20 = vector.load %arg3[%c0_17, %c0_18, %c0_19, %c0_20] : memref<1x1x18x128xbf16, #tpu.memory_space<vmem>>, vector<1x1x18x128xbf16>
    %21 = vector.shape_cast %20 : vector<1x1x18x128xbf16> to vector<18x128xbf16>
    %22 = vector.extract_strided_slice %21 {offsets = [0, 0], sizes = [16, 128], strides = [1, 1]} : vector<18x128xbf16> to vector<16x128xbf16>
    %c1_21 = arith.constant 1 : index
    %c0_22 = arith.constant 0 : index
    %c0_23 = arith.constant 0 : index
    %c0_24 = arith.constant 0 : index
    %23 = vector.load %arg5[%c1_21, %c0_22, %c0_23, %c0_24] : memref<3x3x128x128xbf16, #tpu.memory_space<vmem>>, vector<1x1x128x128xbf16>
    %24 = vector.shape_cast %23 : vector<1x1x128x128xbf16> to vector<128x128xbf16>
    %cst_25 = arith.constant dense<0.000000e+00> : vector<16x128xf32>
    %25 = tpu.matmul %22, %24, %cst_25 {dimension_numbers = #tpu.dot_dimension_numbers<[1], [0], [0], [1], [0, 0, 1, 1], [], []>} : vector<16x128xbf16>, vector<128x128xbf16>, vector<16x128xf32> -> vector<16x128xf32>
    %26 = arith.addf %19, %25 : vector<16x128xf32>
    %27 = vector.extract_strided_slice %21 {offsets = [1, 0], sizes = [16, 128], strides = [1, 1]} : vector<18x128xbf16> to vector<16x128xbf16>
    %c1_26 = arith.constant 1 : index
    %c1_27 = arith.constant 1 : index
    %c0_28 = arith.constant 0 : index
    %c0_29 = arith.constant 0 : index
    %28 = vector.load %arg5[%c1_26, %c1_27, %c0_28, %c0_29] : memref<3x3x128x128xbf16, #tpu.memory_space<vmem>>, vector<1x1x128x128xbf16>
    %29 = vector.shape_cast %28 : vector<1x1x128x128xbf16> to vector<128x128xbf16>
    %cst_30 = arith.constant dense<0.000000e+00> : vector<16x128xf32>
    %30 = tpu.matmul %27, %29, %cst_30 {dimension_numbers = #tpu.dot_dimension_numbers<[1], [0], [0], [1], [0, 0, 1, 1], [], []>} : vector<16x128xbf16>, vector<128x128xbf16>, vector<16x128xf32> -> vector<16x128xf32>
    %31 = arith.addf %26, %30 : vector<16x128xf32>
    %32 = vector.extract_strided_slice %21 {offsets = [2, 0], sizes = [16, 128], strides = [1, 1]} : vector<18x128xbf16> to vector<16x128xbf16>
    %c1_31 = arith.constant 1 : index
    %c2_32 = arith.constant 2 : index
    %c0_33 = arith.constant 0 : index
    %c0_34 = arith.constant 0 : index
    %33 = vector.load %arg5[%c1_31, %c2_32, %c0_33, %c0_34] : memref<3x3x128x128xbf16, #tpu.memory_space<vmem>>, vector<1x1x128x128xbf16>
    %34 = vector.shape_cast %33 : vector<1x1x128x128xbf16> to vector<128x128xbf16>
    %cst_35 = arith.constant dense<0.000000e+00> : vector<16x128xf32>
    %35 = tpu.matmul %32, %34, %cst_35 {dimension_numbers = #tpu.dot_dimension_numbers<[1], [0], [0], [1], [0, 0, 1, 1], [], []>} : vector<16x128xbf16>, vector<128x128xbf16>, vector<16x128xf32> -> vector<16x128xf32>
    %36 = arith.addf %31, %35 : vector<16x128xf32>
    %c0_36 = arith.constant 0 : index
    %c0_37 = arith.constant 0 : index
    %c0_38 = arith.constant 0 : index
    %c0_39 = arith.constant 0 : index
    %37 = vector.load %arg4[%c0_36, %c0_37, %c0_38, %c0_39] : memref<1x1x18x128xbf16, #tpu.memory_space<vmem>>, vector<1x1x18x128xbf16>
    %38 = vector.shape_cast %37 : vector<1x1x18x128xbf16> to vector<18x128xbf16>
    %39 = vector.extract_strided_slice %38 {offsets = [0, 0], sizes = [16, 128], strides = [1, 1]} : vector<18x128xbf16> to vector<16x128xbf16>
    %c2_40 = arith.constant 2 : index
    %c0_41 = arith.constant 0 : index
    %c0_42 = arith.constant 0 : index
    %c0_43 = arith.constant 0 : index
    %40 = vector.load %arg5[%c2_40, %c0_41, %c0_42, %c0_43] : memref<3x3x128x128xbf16, #tpu.memory_space<vmem>>, vector<1x1x128x128xbf16>
    %41 = vector.shape_cast %40 : vector<1x1x128x128xbf16> to vector<128x128xbf16>
    %cst_44 = arith.constant dense<0.000000e+00> : vector<16x128xf32>
    %42 = tpu.matmul %39, %41, %cst_44 {dimension_numbers = #tpu.dot_dimension_numbers<[1], [0], [0], [1], [0, 0, 1, 1], [], []>} : vector<16x128xbf16>, vector<128x128xbf16>, vector<16x128xf32> -> vector<16x128xf32>
    %43 = arith.addf %36, %42 : vector<16x128xf32>
    %44 = vector.extract_strided_slice %38 {offsets = [1, 0], sizes = [16, 128], strides = [1, 1]} : vector<18x128xbf16> to vector<16x128xbf16>
    %c2_45 = arith.constant 2 : index
    %c1_46 = arith.constant 1 : index
    %c0_47 = arith.constant 0 : index
    %c0_48 = arith.constant 0 : index
    %45 = vector.load %arg5[%c2_45, %c1_46, %c0_47, %c0_48] : memref<3x3x128x128xbf16, #tpu.memory_space<vmem>>, vector<1x1x128x128xbf16>
    %46 = vector.shape_cast %45 : vector<1x1x128x128xbf16> to vector<128x128xbf16>
    %cst_49 = arith.constant dense<0.000000e+00> : vector<16x128xf32>
    %47 = tpu.matmul %44, %46, %cst_49 {dimension_numbers = #tpu.dot_dimension_numbers<[1], [0], [0], [1], [0, 0, 1, 1], [], []>} : vector<16x128xbf16>, vector<128x128xbf16>, vector<16x128xf32> -> vector<16x128xf32>
    %48 = arith.addf %43, %47 : vector<16x128xf32>
    %49 = vector.extract_strided_slice %38 {offsets = [2, 0], sizes = [16, 128], strides = [1, 1]} : vector<18x128xbf16> to vector<16x128xbf16>
    %c2_50 = arith.constant 2 : index
    %c2_51 = arith.constant 2 : index
    %c0_52 = arith.constant 0 : index
    %c0_53 = arith.constant 0 : index
    %50 = vector.load %arg5[%c2_50, %c2_51, %c0_52, %c0_53] : memref<3x3x128x128xbf16, #tpu.memory_space<vmem>>, vector<1x1x128x128xbf16>
    %51 = vector.shape_cast %50 : vector<1x1x128x128xbf16> to vector<128x128xbf16>
    %cst_54 = arith.constant dense<0.000000e+00> : vector<16x128xf32>
    %52 = tpu.matmul %49, %51, %cst_54 {dimension_numbers = #tpu.dot_dimension_numbers<[1], [0], [0], [1], [0, 0, 1, 1], [], []>} : vector<16x128xbf16>, vector<128x128xbf16>, vector<16x128xf32> -> vector<16x128xf32>
    %53 = arith.addf %48, %52 : vector<16x128xf32>
    %c0_55 = arith.constant 0 : index
    %c0_56 = arith.constant 0 : index
    %c0_57 = arith.constant 0 : index
    %c0_58 = arith.constant 0 : index
    %54 = vector.load %arg7[%c0_55, %c0_56, %c0_57, %c0_58] : memref<1x1x16x128xf32, #tpu.memory_space<vmem>>, vector<1x1x16x128xf32>
    %55 = vector.shape_cast %54 : vector<1x1x16x128xf32> to vector<16x128xf32>
    %56 = arith.addf %53, %55 : vector<16x128xf32>
    %c0_59 = arith.constant 0 : index
    %c0_60 = arith.constant 0 : index
    %c0_61 = arith.constant 0 : index
    %c0_62 = arith.constant 0 : index
    %57 = vector.load %arg8[%c0_59, %c0_60, %c0_61, %c0_62] : memref<1x1x16x128xf32, #tpu.memory_space<vmem>>, vector<1x1x16x128xf32>
    %58 = vector.shape_cast %57 : vector<1x1x16x128xf32> to vector<16x128xf32>
    %59 = vector.shape_cast %56 : vector<16x128xf32> to vector<1x1x16x128xf32>
    tpu.vector_store %arg8[%c0_59, %c0_60, %c0_61, %c0_62], %59 {strides = array<i32>} : memref<1x1x16x128xf32, #tpu.memory_space<vmem>>, vector<1x1x16x128xf32>,
    return
  }
  func.func @transform_0(%arg0: i32, %arg1: i32) -> (i32, i32, i32, i32) {
    %c0_i32 = arith.constant 0 : i32
    %c0_i32_0 = arith.constant 0 : i32
    %c0_i32_1 = arith.constant 0 : i32
    return %arg0, %arg1, %c0_i32, %c0_i32_0 : i32, i32, i32, i32
  }
  func.func @transform_1(%arg0: i32, %arg1: i32) -> (i32, i32, i32, i32) {
    %c1_i32 = arith.constant 1 : i32
    %0 = arith.addi %arg1, %c1_i32 : i32
    %c0_i32 = arith.constant 0 : i32
    %c0_i32_0 = arith.constant 0 : i32
    %c0_i32_1 = arith.constant 0 : i32
    return %arg0, %0, %c0_i32, %c0_i32_0 : i32, i32, i32, i32
  }
  func.func @transform_2(%arg0: i32, %arg1: i32) -> (i32, i32, i32, i32) {
    %c2_i32 = arith.constant 2 : i32
    %0 = arith.addi %arg1, %c2_i32 : i32
    %c0_i32 = arith.constant 0 : i32
    %c0_i32_0 = arith.constant 0 : i32
    %c0_i32_1 = arith.constant 0 : i32
    return %arg0, %0, %c0_i32, %c0_i32_0 : i32, i32, i32, i32
  }
  func.func @transform_3(%arg0: i32, %arg1: i32) -> (i32, i32, i32, i32) {
    %c0_i32 = arith.constant 0 : i32
    %c0_i32_0 = arith.constant 0 : i32
    %c0_i32_1 = arith.constant 0 : i32
    %c0_i32_2 = arith.constant 0 : i32
    %c0_i32_3 = arith.constant 0 : i32
    return %c0_i32, %c0_i32_0, %c0_i32_1, %c0_i32_2 : i32, i32, i32, i32
  }
  func.func @transform_4(%arg0: i32, %arg1: i32) -> (i32, i32) {
    %c0_i32 = arith.constant 0 : i32
    %c0_i32_0 = arith.constant 0 : i32
    %c0_i32_1 = arith.constant 0 : i32
    return %c0_i32, %c0_i32_0 : i32, i32
  }
  func.func @transform_5(%arg0: i32, %arg1: i32) -> (i32, i32, i32, i32) {
    %c0_i32 = arith.constant 0 : i32
    %c0_i32_0 = arith.constant 0 : i32
    %c0_i32_1 = arith.constant 0 : i32
    return %arg0, %arg1, %c0_i32, %c0_i32_0 : i32, i32, i32, i32
  }
  func.func @transform_6(%arg0: i32, %arg1: i32) -> (i32, i32, i32, i32) {
    %c0_i32 = arith.constant 0 : i32
    %c0_i32_0 = arith.constant 0 : i32
    %c0_i32_1 = arith.constant 0 : i32
    return %arg0, %arg1, %c0_i32, %c0_i32_0 : i32, i32, i32, i32
  }
}

</mosaic_0001>

<bundles_post_ra>
// kernel: forward.3
= control target key start
LH: loop header
LB: loop body
LE: loop exit
PB: predicated region body
PF: predicated region fallthrough
CT: control target
= control target key end

     0   :  { %s2321_s21 = smov 0   ;;  %s2323_s22 = smov 0   ;;  %s2741_s0 = inlined_call_operand.vmem [shape: bf16[2,18,18,128], index: 0, kind: input, shape index: {}, may-alias: {0,1,2}]   ;;  %s2742_s1 = inlined_call_operand.vmem [shape: bf16[2,18,18,128], index: 1, kind: input, shape index: {}, may-alias: {0,1,2}]   ;;  %s2743_s2 = inlined_call_operand.vmem [shape: bf16[2,18,18,128], index: 2, kind: input, shape index: {}, may-alias: {0,1,2}]   ;;  %s2744_s3 = inlined_call_operand.vmem [shape: bf16[3,3,128,128], index: 3, kind: input, shape index: {}]   ;;  %s2745_s4 = inlined_call_operand.vmem [shape: f32[1,128], index: 4, kind: input, shape index: {}]   ;;  %s2746_s5 = inlined_call_operand.vmem [shape: f32[2,16,16,128], index: 5, kind: input, shape index: {}]   ;;  %s2747_s6 = inlined_call_operand.vmem [shape: f32[2,16,16,128], index: 6, kind: output, shape index: {}]  }
   0x1   :  { %s2325_s23 = smov 0   ;;  %s2327_s24 = smov 0  }
   0x2   :  { %s2329_s25 = smov 0  }
   0x3 LB: > { %s25_s26 = sadd.s32 1, %s2274_s23  ;;  %s28_s27 = sadd.s32 1, %s2278_s24  ;;  %s2282_s25 = sphi %s2329_s25, %s16_s25   ;;  %s2278_s24 = sphi %s2327_s24, %s2751_s24   ;;  %s2274_s23 = sphi %s2325_s23, %s2750_s23   ;;  %s2270_s22 = sphi %s2323_s22, %s2749_s22   ;;  %s2266_s21 = sphi %s2321_s21, %s2748_s21  }
   0x4   : > { %p26_p0 = scmp.ge.s32.totalorder %s25_s26, 16  ;;  %p1640_p1 = scmp.ge.s32.totalorder %s2282_s25, 1 }
   0x5   : > { %p288_p2 = scmp.lt.s32.totalorder %s2282_s25, 33 }
   0x6   : > { %s2753_s26 = smov (%p26_p0, %s25_s26), 0  ;;  %s2755_s27 = smov (!%p26_p0, %s28_s27), %s2278_s24 }
   0x7   : > { %p289_p3 = pnand %p1640_p1, %p288_p2  ;;  %p30_p4 = scmp.ge.s32.totalorder %s2755_s27, 2 }
   0x8   : > { %v2166_v0 = vld [vmem:[%s2744_s3] sm:$0xff] (!%p289_p3)   ;;  %v2284_v1 = vmov (!%p289_p3), 0.0   ;;  %v2168_v3 = vld [vmem:[%s2744_s3 + $0x8] sm:$0xff] (!%p289_p3)   ;;  %vm2285_vm0 = vmmov (!%p289_p3), 0   ;;  %p355_p5 = scmp.lt.s32.totalorder (!%p289_p3), %s2270_s22, 1  ;;  %p357_p6 = scmp.lt.s32.totalorder (!%p289_p3), %s2266_s21, 17 }
   0x9   : > { %s2757_s27 = smov (%p30_p4, %s2755_s27), 0  ;;  %292 = sbr.rel (%p289_p3) target bundleno = 389 (0x185), region = 44 }
   0xa   : > { %1940 = vmatprep.subr.bf16.mxu0 (!%p289_p3), %v2284_v1  ;;  %1960 = vmatprep.subr.bf16.mxu1 (!%p289_p3), %v2284_v1  ;;  %v2167_v2 = vld [vmem:[%s2744_s3 + $0x40] sm:$0xff] (!%p289_p3)   ;;  %v2169_v4 = vld [vmem:[%s2744_s3 + $0x48] sm:$0xff] (!%p289_p3)   ;;  %v2170_v5 = vld [vmem:[%s2744_s3 + $0x10] sm:$0xff] (!%p289_p3)   ;;  %s364_s11 = sadd.s32 (!%p289_p3), 1, %s2266_s21  ;;  %vm548_vm1 = vsmask.f32 (!%p289_p3), 7424 }
   0xb   : > { %1941 = vmatpush3.bf16.msra.mxu0 (!%p289_p3), %v2166_v0  ;;  %1956 = vmatprep.mubr.msk.bf16.mxu0 (!%p289_p3), %vm2285_vm0, %v2284_v1  ;;  %v2171_v6 = vld [vmem:[%s2744_s3 + $0x50] sm:$0xff] (!%p289_p3)   ;;  %v2172_v7 = vld [vmem:[%s2744_s3 + $0x18] sm:$0xff] (!%p289_p3)   ;;  %v2174_v9 = vld [vmem:[%s2744_s3 + $0x20] sm:$0xff] (!%p289_p3)   ;;  %p367_p7 = scmp.lt.s32.totalorder (!%p289_p3), %s364_s11, 17  ;;  %s375_s28 = sadd.s32 (!%p289_p3), 2, %s2266_s21  ;;  %vm670_vm2 = vcmask (!%p289_p3), 1046528  }
   0xc   : > { %1961 = vmatpush3.bf16.msra.mxu1 (!%p289_p3), %v2167_v2  ;;  %1942 = vmatprep.subr.bf16.mxu0 (!%p289_p3), %v2284_v1  ;;  %v2173_v8 = vld [vmem:[%s2744_s3 + $0x58] sm:$0xff] (!%p289_p3)   ;;  %v2175_v10 = vld [vmem:[%s2744_s3 + $0x60] sm:$0xff] (!%p289_p3)   ;;  %v2176_v12 = vld [vmem:[%s2744_s3 + $0x28] sm:$0xff] (!%p289_p3)   ;;  %p378_p8 = scmp.lt.s32.totalorder (!%p289_p3), %s375_s28, 17  ;;  %p388_p9 = scmp.lt.s32.totalorder (!%p289_p3), %s2266_s21, 15 }
   0xd   : > { %1962 = vmatprep.subr.bf16.mxu1 (!%p289_p3), %v2284_v1  ;;  %1976 = vmatprep.mubr.msk.bf16.mxu1 (!%p289_p3), %vm2285_vm0, %v2284_v1  ;;  %v2177_v14 = vld [vmem:[%s2744_s3 + $0x68] sm:$0xff] (!%p289_p3)   ;;  %v2178_v16 = vld [vmem:[%s2744_s3 + $0x30] sm:$0xff] (!%p289_p3)   ;;  %v2180_v21 = vld [vmem:[%s2744_s3 + $0x38] sm:$0xff] (!%p289_p3)  }
   0xe   : > { %v2179_v17 = vld [vmem:[%s2744_s3 + $0x70] sm:$0xff] (!%p289_p3)   ;;  %v2181_v22 = vld [vmem:[%s2744_s3 + $0x78] sm:$0xff] (!%p289_p3)   ;;  %v2183_v25 = vld [vmem:[%s2744_s3 + $0x80] sm:$0xff] (!%p289_p3)  }
   0xf   : > { %1943 = vmatpush3.bf16.msra.mxu0 (!%p289_p3), %v2168_v3  ;;  %v2185_v27 = vld [vmem:[%s2744_s3 + $0xc0] sm:$0xff] (!%p289_p3)   ;;  %v2186_v28 = vld [vmem:[%s2744_s3 + $0x88] sm:$0xff] (!%p289_p3)   ;;  %v2188_v30 = vld [vmem:[%s2744_s3 + $0x90] sm:$0xff] (!%p289_p3)  }
  0x10   : > { %s2759_s22 = smov (!%p355_p5, %s2270_s22), 1  ;;  %1963 = vmatpush3.bf16.msra.mxu1 %v2169_v4  ;;  %1944 = vmatprep.subr.bf16.mxu0 %v2284_v1  ;;  %s2761_s11 = smov (!%p367_p7, %s364_s11), 17  ;;  %v2187_v29 = vld [vmem:[%s2744_s3 + $0xc8] sm:$0xff]   ;;  %v2189_v31 = vld [vmem:[%s2744_s3 + $0xd0] sm:$0xff]   ;;  %v2190_v32 = vld [vmem:[%s2744_s3 + $0x98] sm:$0xff]  }
  0x11   : > { %s358_s12 = scalar_select %p357_p6, %s2266_s21, 17  ;;  %1964 = vmatprep.subr.bf16.mxu1 %v2284_v1  ;;  %v2191_v33 = vld [vmem:[%s2744_s3 + $0xd8] sm:$0xff]   ;;  %v2192_v34 = vld [vmem:[%s2744_s3 + $0xa0] sm:$0xff]   ;;  %v2194_v36 = vld [vmem:[%s2744_s3 + $0xa8] sm:$0xff]  }
  0x12   : > { %s2385_s15 = smul.u32 54, %s2759_s22  ;;  %v2193_v35 = vld [vmem:[%s2744_s3 + $0xe0] sm:$0xff]   ;;  %v2195_v37 = vld [vmem:[%s2744_s3 + $0xe8] sm:$0xff]   ;;  %s2763_s28 = smov (!%p378_p8, %s375_s28), 17  ;;  %v2196_v38 = vld [vmem:[%s2744_s3 + $0xb0] sm:$0xff]  }
  0x13   : > { %s2120_s18 = smul.u32 3, %s358_s12  ;;  %1945 = vmatpush3.bf16.msra.mxu0 %v2170_v5  ;;  %v2197_v39 = vld [vmem:[%s2744_s3 + $0xf0] sm:$0xff]   ;;  %v2198_v41 = vld [vmem:[%s2744_s3 + $0xb8] sm:$0xff]   ;;  %v2200_v44 = vld [vmem:[%s2744_s3 + $0x100] sm:$0xff]   ;;  %s2765_s21 = smov (!%p388_p9, %s2266_s21), 15 }
  0x14   : > { %1965 = vmatpush3.bf16.msra.mxu1 %v2171_v6  ;;  %1946 = vmatprep.subr.bf16.mxu0 %v2284_v1  ;;  %s2122_s8 = smul.u32 3, %s2761_s11  ;;  %v2199_v43 = vld [vmem:[%s2744_s3 + $0xf8] sm:$0xff]   ;;  %v2202_v47 = vld [vmem:[%s2744_s3 + $0x140] sm:$0xff]   ;;  %v2203_v48 = vld [vmem:[%s2744_s3 + $0x108] sm:$0xff]  }
  0x15   : > { %s361_s19 = sadd.s32 %s2385_s15, %s2120_s18  ;;  %1966 = vmatprep.subr.bf16.mxu1 %v2284_v1  ;;  %s2123_s17 = smul.u32 3, %s2763_s28  ;;  %v2204_v49 = vld [vmem:[%s2744_s3 + $0x148] sm:$0xff]   ;;  %v2205_v50 = vld [vmem:[%s2744_s3 + $0x110] sm:$0xff]   ;;  %v2207_v52 = vld [vmem:[%s2744_s3 + $0x118] sm:$0xff]  }
  0x16   : > { %s1641_s29 = sshll.u32 %s361_s19, 2  ;;  %s371_s14 = sadd.s32 %s2122_s8, %s2385_s15  ;;  %v2206_v51 = vld [vmem:[%s2744_s3 + $0x150] sm:$0xff]   ;;  %v2208_v53 = vld [vmem:[%s2744_s3 + $0x158] sm:$0xff]   ;;  %v2209_v54 = vld [vmem:[%s2744_s3 + $0x120] sm:$0xff]  }
  0x17   : > { %s363_s10 = scalar_lea.vmem %s2741_s0, %s1641_s29  ;;  %1947 = vmatpush3.bf16.msra.mxu0 %v2172_v7  ;;  %s1642_s19 = sshll.u32 %s371_s14, 2  ;;  %v2210_v55 = vld [vmem:[%s2744_s3 + $0x160] sm:$0xff]   ;;  %v2211_v56 = vld [vmem:[%s2744_s3 + $0x128] sm:$0xff]   ;;  %v2213_v60 = vld [vmem:[%s2744_s3 + $0x130] sm:$0xff]  }
  0x18   : > { %1967 = vmatpush3.bf16.msra.mxu1 %v2173_v8  ;;  %1948 = vmatprep.subr.bf16.mxu0 %v2284_v1  ;;  %v2413_v11 = vld [vmem:[%s363_s10] sm:$0xff]   ;;  %v2418_v13 = vld [vmem:[%s363_s10 + $0x8] ss:$0 sps:$4 sm:$0x11]   ;;  %s2461_s7 = scalar_lea.vmem %s2742_s1, %s1642_s19  ;;  %s382_s28 = sadd.s32 %s2123_s17, %s2385_s15  ;;  %v2214_v0 = vld [vmem:[%s2744_s3 + $0x170] sm:$0xff]  }
  0x19   : > { %1968 = vmatprep.subr.bf16.mxu1 %v2284_v1  ;;  %v552_v15 = vshll.u32 %v2413_v11, 16  ;;  %v550_v18 = vshrl.u32 %v2413_v11, 16  ;;  %v557_v20 = vshll.u32 %v2418_v13, 16  ;;  %v671_v40 = vrot.slane %v2413_v11, 1  ;;  %v2529_v46 = vld [vmem:[%s2461_s7] sm:$0xff]   ;;  %s1643_s12 = sshll.u32 %s382_s28, 2 }
  0x1a   : > { %v672_v42 = vrot.slane %v2418_v13, 1  ;;  %s2547_s18 = scalar_lea.vmem %s2743_s2, %s1643_s12  ;;  %v2217_v57 = vld [vmem:[%s2461_s7 + $0x8] ss:$0 sps:$4 sm:$0x11]   ;;  %v906_v58 = vshll.u32 %v2529_v46, 16  ;;  %v904_v61 = vshrl.u32 %v2529_v46, 16 }
  0x1b   : > { %1949 = vmatpush3.bf16.msra.mxu0 %v2174_v9  ;;  %v554_v19 = vrot.slane %v552_v15, 1  ;;  %v559_v24 = vrot.slane %v557_v20, 1  ;;  %v2212_v59 = vld [vmem:[%s2744_s3 + $0x168] sm:$0xff]   ;;  %v911_v63 = vshll.u32 %v2217_v57, 16  ;;  %v2215_v2 = vld [vmem:[%s2744_s3 + $0x138] sm:$0xff]   ;;  %v1024_v6 = vrot.slane %v2529_v46, 1 }
  0x1c   : > { %1969 = vmatpush3.bf16.msra.mxu1 %v2175_v10  ;;  %1950 = vmatprep.subr.bf16.mxu0 %v2284_v1  ;;  %v673_v45 = vsel %vm670_vm2, %v671_v40, %v672_v42  ;;  %v908_v62 = vrot.slane %v906_v58, 1  ;;  %v2216_v5 = vld [vmem:[%s2744_s3 + $0x178] sm:$0xff]   ;;  %v1025_v7 = vrot.slane %v2217_v57, 1  ;;  %v2218_v9 = vld [vmem:[%s2744_s3 + $0x180] sm:$0xff]   ;;  %v2221_v13 = vld [vmem:[%s2744_s3 + $0x1c8] sm:$0xff]   ;;  %s1644_s12 = sshll.u32 %s2765_s21, 1 }
  0x1d   : > { %1970 = vmatprep.subr.bf16.mxu1 %v2284_v1  ;;  %v555_v23 = vor.u32 %v554_v19, %v550_v18  ;;  %v913_v4 = vrot.slane %v911_v63, 1  ;;  %v2223_v15 = vld [vmem:[%s2744_s3 + $0x1d0] sm:$0xff]   ;;  %v2226_v18 = vld [vmem:[%s2744_s3 + $0x1a0] sm:$0xff]   ;;  %v2241_v40 = vld [vmem:[%s2744_s3 + $0x228] sm:$0xff]   ;;  %s1645_s15 = sshll.u32 %s2759_s22, 5 }
  0x1e   : > { %v909_v3 = vor.u32 %v908_v62, %v904_v61  ;;  %v1026_v10 = vsel %vm670_vm2, %v1024_v6, %v1025_v7  ;;  %v2227_v19 = vld [vmem:[%s2744_s3 + $0x1e0] sm:$0xff]   ;;  %v2243_v42 = vld [vmem:[%s2744_s3 + $0x238] sm:$0xff]   ;;  %s392_s13 = sadd.s32 %s1645_s15, %s1644_s12 }
  0x1f   : > { %1951 = vmatpush3.bf16.msra.mxu0 %v2176_v12  ;;  %v560_v26 = vsel %vm548_vm1, %v555_v23, %v559_v24  ;;  %v2220_v12 = vld [vmem:[%s2744_s3 + $0x188] sm:$0xff]   ;;  %v2234_v20 = vld [vmem:[%s2547_s18] sm:$0xff]   ;;  %s1646_s14 = sshll.u32 %s392_s13, 3 }
  0x20   : > { %1971 = vmatpush3.bf16.msra.mxu1 %v2177_v14  ;;  %1952 = vmatprep.subr.bf16.mxu0 %v2284_v1  ;;  %v914_v8 = vsel %vm548_vm1, %v909_v3, %v913_v4  ;;  %v2222_v14 = vld [vmem:[%s2744_s3 + $0x190] sm:$0xff]   ;;  %v2236_v23 = vld [vmem:[%s2547_s18 + $0x8] ss:$0 sps:$4 sm:$0x11]   ;;  %v1259_v24 = vshll.u32 %v2234_v20, 16  ;;  %s394_s17 = scalar_lea.vmem %s2746_s5, %s1646_s14  ;;  %s403_s29 = scalar_lea.vmem %s2747_s6, %s1646_s14 }
  0x21   : > { %1972 = vmatprep.subr.bf16.mxu1 %v2284_v1 }
  0x23   : > { %1953 = vmatpush3.bf16.msra.mxu0 %v2178_v16  ;;  %v2224_v16 = vld [vmem:[%s2744_s3 + $0x198] sm:$0xff]  }
  0x24   : > { %1973 = vmatpush3.bf16.msra.mxu1 %v2179_v17  ;;  %1954 = vmatprep.subr.bf16.mxu0 %v2284_v1  ;;  %v2225_v17 = vld [vmem:[%s2744_s3 + $0x1d8] sm:$0xff]  }
  0x25   : > { %1974 = vmatprep.subr.bf16.mxu1 %v2284_v1 }
  0x27   : > { %1955 = vmatpush3.bf16.msra.mxu0 %v2180_v21  ;;  %v2228_v21 = vld [vmem:[%s2744_s3 + $0x1a8] sm:$0xff]  }
  0x28   : > { %1975 = vmatpush3.bf16.msra.mxu1 %v2181_v22  ;;  %1980 = vmatprep.subr.bf16.mxu0 %v2284_v1  ;;  %v2229_v22 = vld [vmem:[%s2744_s3 + $0x1e8] sm:$0xff]  }
  0x29   : > { %2000 = vmatprep.subr.bf16.mxu1 %v2284_v1 }
  0x2a   : > { %1957 = vmatmul.mubr.bf16.vlgmr.msra.gmra.mrb[0].mxu0 %v2413_v11  ;;  %v2219_v11 = vld [vmem:[%s2744_s3 + $0x1c0] sm:$0xff]  }
  0x2b   : > { %1981 = vmatpush3.bf16.msra.mxu0 %v2183_v25  ;;  %1977 = vmatmul.mubr.bf16.vlgmr.msra.gmra.mrb[0].mxu1 %v560_v26  ;;  %v2230_v25 = vld [vmem:[%s2744_s3 + $0x1b0] sm:$0xff]  }
  0x2c   : > { %2001 = vmatpush3.bf16.msra.mxu1 %v2185_v27  ;;  %1982 = vmatprep.subr.bf16.mxu0 %v2284_v1  ;;  %v2231_v26 = vld [vmem:[%s2744_s3 + $0x1f0] sm:$0xff]   ;;  %v1257_v27 = vshrl.u32 %v2234_v20, 16 }
  0x2d   : > { %2002 = vmatprep.subr.bf16.mxu1 %v2284_v1  ;;  %1996 = vmatprep.mubr.msk.bf16.mxu0 %vm2285_vm0, %v2284_v1 }
  0x2e   : > { %2016 = vmatprep.mubr.msk.bf16.mxu1 %vm2285_vm0, %v2284_v1 }
  0x2f   : > { %1983 = vmatpush3.bf16.msra.mxu0 %v2186_v28  ;;  %v1261_v28 = vrot.slane %v1259_v24, 1 }
  0x30   : > { %2003 = vmatpush3.bf16.msra.mxu1 %v2187_v29  ;;  %1984 = vmatprep.subr.bf16.mxu0 %v2284_v1  ;;  %v1264_v29 = vshll.u32 %v2236_v23, 16 }
  0x31   : > { %2004 = vmatprep.subr.bf16.mxu1 %v2284_v1 }
  0x33   : > { %1985 = vmatpush3.bf16.msra.mxu0 %v2188_v30  ;;  %v2232_v30 = vld [vmem:[%s2744_s3 + $0x1b8] sm:$0xff]  }
  0x34   : > { %2005 = vmatpush3.bf16.msra.mxu1 %v2189_v31  ;;  %1986 = vmatprep.subr.bf16.mxu0 %v2284_v1  ;;  %v2233_v31 = vld [vmem:[%s2744_s3 + $0x1f8] sm:$0xff]  }
  0x35   : > { %2006 = vmatprep.subr.bf16.mxu1 %v2284_v1 }
  0x37   : > { %1987 = vmatpush3.bf16.msra.mxu0 %v2190_v32  ;;  %v1262_v32 = vor.u32 %v1261_v28, %v1257_v27 }
  0x38   : > { %2007 = vmatpush3.bf16.msra.mxu1 %v2191_v33  ;;  %1988 = vmatprep.subr.bf16.mxu0 %v2284_v1  ;;  %v1266_v33 = vrot.slane %v1264_v29, 1 }
  0x39   : > { %2008 = vmatprep.subr.bf16.mxu1 %v2284_v1 }
  0x3b   : > { %1989 = vmatpush3.bf16.msra.mxu0 %v2192_v34  ;;  %v2235_v34 = vld [vmem:[%s2744_s3 + $0x200] sm:$0xff]  }
  0x3c   : > { %2009 = vmatpush3.bf16.msra.mxu1 %v2193_v35  ;;  %1990 = vmatprep.subr.bf16.mxu0 %v2284_v1  ;;  %v1267_v35 = vsel %vm548_vm1, %v1262_v32, %v1266_v33  ;;  %v1472_v32 = vld [vmem:[%s394_s17] sm:$0xff] }
  0x3d   : > { %2010 = vmatprep.subr.bf16.mxu1 %v2284_v1 }
  0x3f   : > { %1991 = vmatpush3.bf16.msra.mxu0 %v2194_v36  ;;  %v2237_v36 = vld [vmem:[%s2744_s3 + $0x208] sm:$0xff]  }
  0x40   : > { %2011 = vmatpush3.bf16.msra.mxu1 %v2195_v37  ;;  %1992 = vmatprep.subr.bf16.mxu0 %v2284_v1  ;;  %v2238_v37 = vld [vmem:[%s2744_s3 + $0x210] sm:$0xff]  }
  0x41   : > { %2012 = vmatprep.subr.bf16.mxu1 %v2284_v1 }
  0x43   : > { %1993 = vmatpush3.bf16.msra.mxu0 %v2196_v38  ;;  %v2239_v38 = vld [vmem:[%s2744_s3 + $0x218] sm:$0xff]  }
  0x44   : > { %2013 = vmatpush3.bf16.msra.mxu1 %v2197_v39  ;;  %1994 = vmatprep.subr.bf16.mxu0 %v2284_v1  ;;  %v2240_v39 = vld [vmem:[%s2744_s3 + $0x220] sm:$0xff]  }
  0x45   : > { %2014 = vmatprep.subr.bf16.mxu1 %v2284_v1 }
  0x47   : > { %1995 = vmatpush3.bf16.msra.mxu0 %v2198_v41  ;;  %v2242_v41 = vld [vmem:[%s2744_s3 + $0x230] sm:$0xff]  }
  0x48   : > { %2015 = vmatpush3.bf16.msra.mxu1 %v2199_v43  ;;  %2020 = vmatprep.subr.bf16.mxu0 %v2284_v1  ;;  %v1377_v43 = vrot.slane %v2234_v20, 1 }
  0x49   : > { %2040 = vmatprep.subr.bf16.mxu1 %v2284_v1 }
  0x4a   : > { %1997 = vmatmul.mubr.bf16.vlgmr.msra.gmra.mrb[4].mxu0 %v673_v45 }
  0x4b   : > { %2021 = vmatpush3.bf16.msra.mxu0 %v2200_v44  ;;  %2017 = vmatmul.mubr.bf16.vlgmr.msra.gmra.mrb[4].mxu1 %v2529_v46  ;;  %v1378_v44 = vrot.slane %v2236_v23, 1  ;;  %v1650_v46 = vld [vmem:[%s2745_s4] ss:$0 sm:$0xff] }
  0x4c   : > { %2041 = vmatpush3.bf16.msra.mxu1 %v2202_v47  ;;  %2022 = vmatprep.subr.bf16.mxu0 %v2284_v1 }
  0x4d   : > { %2042 = vmatprep.subr.bf16.mxu1 %v2284_v1  ;;  %2036 = vmatprep.mubr.msk.bf16.mxu0 %vm2285_vm0, %v2284_v1  ;;  %v1379_v45 = vsel %vm670_vm2, %v1377_v43, %v1378_v44 }
  0x4e   : > { %2056 = vmatprep.mubr.msk.bf16.mxu1 %vm2285_vm0, %v2284_v1 }
  0x4f   : > { %2023 = vmatpush3.bf16.msra.mxu0 %v2203_v48 }
  0x50   : > { %2043 = vmatpush3.bf16.msra.mxu1 %v2204_v49  ;;  %2024 = vmatprep.subr.bf16.mxu0 %v2284_v1 }
  0x51   : > { %2044 = vmatprep.subr.bf16.mxu1 %v2284_v1 }
  0x53   : > { %2025 = vmatpush3.bf16.msra.mxu0 %v2205_v50 }
  0x54   : > { %2045 = vmatpush3.bf16.msra.mxu1 %v2206_v51  ;;  %2026 = vmatprep.subr.bf16.mxu0 %v2284_v1 }
  0x55   : > { %2046 = vmatprep.subr.bf16.mxu1 %v2284_v1 }
  0x57   : > { %2027 = vmatpush3.bf16.msra.mxu0 %v2207_v52 }
  0x58   : > { %2047 = vmatpush3.bf16.msra.mxu1 %v2208_v53  ;;  %2028 = vmatprep.subr.bf16.mxu0 %v2284_v1 }
  0x59   : > { %2048 = vmatprep.subr.bf16.mxu1 %v2284_v1 }
  0x5b   : > { %2029 = vmatpush3.bf16.msra.mxu0 %v2209_v54 }
  0x5c   : > { %2049 = vmatpush3.bf16.msra.mxu1 %v2210_v55  ;;  %2030 = vmatprep.subr.bf16.mxu0 %v2284_v1 }
  0x5d   : > { %2050 = vmatprep.subr.bf16.mxu1 %v2284_v1 }
  0x5f   : > { %2031 = vmatpush3.bf16.msra.mxu0 %v2211_v56 }
  0x60   : > { %2051 = vmatpush3.bf16.msra.mxu1 %v2212_v59  ;;  %2032 = vmatprep.subr.bf16.mxu0 %v2284_v1 }
  0x61   : > { %2052 = vmatprep.subr.bf16.mxu1 %v2284_v1 }
  0x63   : > { %2033 = vmatpush3.bf16.msra.mxu0 %v2213_v60 }
  0x64   : > { %2053 = vmatpush3.bf16.msra.mxu1 %v2214_v0  ;;  %2034 = vmatprep.subr.bf16.mxu0 %v2284_v1 }
  0x65   : > { %2054 = vmatprep.subr.bf16.mxu1 %v2284_v1 }
  0x67   : > { %2035 = vmatpush3.bf16.msra.mxu0 %v2215_v2 }
  0x68   : > { %2055 = vmatpush3.bf16.msra.mxu1 %v2216_v5  ;;  %2060 = vmatprep.subr.bf16.mxu0 %v2284_v1 }
  0x69   : > { %2080 = vmatprep.subr.bf16.mxu1 %v2284_v1 }
  0x6a   : > { %2037 = vmatmul.mubr.bf16.vlgmr.msra.gmra.mrb[8].mxu0 %v914_v8 }
  0x6b   : > { %2061 = vmatpush3.bf16.msra.mxu0 %v2218_v9  ;;  %2057 = vmatmul.mubr.bf16.vlgmr.msra.gmra.mrb[8].mxu1 %v1026_v10 }
  0x6c   : > { %2081 = vmatpush3.bf16.msra.mxu1 %v2219_v11  ;;  %2062 = vmatprep.subr.bf16.mxu0 %v2284_v1 }
  0x6d   : > { %2082 = vmatprep.subr.bf16.mxu1 %v2284_v1  ;;  %2076 = vmatprep.mubr.msk.bf16.mxu0 %vm2285_vm0, %v2284_v1 }
  0x6e   : > { %2096 = vmatprep.mubr.msk.bf16.mxu1 %vm2285_vm0, %v2284_v1 }
  0x6f   : > { %2063 = vmatpush3.bf16.msra.mxu0 %v2220_v12 }
  0x70   : > { %2083 = vmatpush3.bf16.msra.mxu1 %v2221_v13  ;;  %2064 = vmatprep.subr.bf16.mxu0 %v2284_v1 }
  0x71   : > { %2084 = vmatprep.subr.bf16.mxu1 %v2284_v1 }
  0x73   : > { %2065 = vmatpush3.bf16.msra.mxu0 %v2222_v14 }
  0x74   : > { %2085 = vmatpush3.bf16.msra.mxu1 %v2223_v15  ;;  %2066 = vmatprep.subr.bf16.mxu0 %v2284_v1 }
  0x75   : > { %2086 = vmatprep.subr.bf16.mxu1 %v2284_v1 }
  0x77   : > { %2067 = vmatpush3.bf16.msra.mxu0 %v2224_v16 }
  0x78   : > { %2087 = vmatpush3.bf16.msra.mxu1 %v2225_v17  ;;  %2068 = vmatprep.subr.bf16.mxu0 %v2284_v1 }
  0x79   : > { %2088 = vmatprep.subr.bf16.mxu1 %v2284_v1 }
  0x7b   : > { %2069 = vmatpush3.bf16.msra.mxu0 %v2226_v18 }
  0x7c   : > { %2089 = vmatpush3.bf16.msra.mxu1 %v2227_v19  ;;  %2070 = vmatprep.subr.bf16.mxu0 %v2284_v1 }
  0x7d   : > { %2090 = vmatprep.subr.bf16.mxu1 %v2284_v1 }
  0x7f   : > { %2071 = vmatpush3.bf16.msra.mxu0 %v2228_v21 }
  0x80   : > { %2091 = vmatpush3.bf16.msra.mxu1 %v2229_v22  ;;  %2072 = vmatprep.subr.bf16.mxu0 %v2284_v1 }
  0x81   : > { %2092 = vmatprep.subr.bf16.mxu1 %v2284_v1 }
  0x83   : > { %2073 = vmatpush3.bf16.msra.mxu0 %v2230_v25 }
  0x84   : > { %2093 = vmatpush3.bf16.msra.mxu1 %v2231_v26  ;;  %2074 = vmatprep.subr.bf16.mxu0 %v2284_v1 }
  0x85   : > { %2094 = vmatprep.subr.bf16.mxu1 %v2284_v1 }
  0x87   : > { %2075 = vmatpush3.bf16.msra.mxu0 %v2232_v30 }
  0x88   : > { %2095 = vmatpush3.bf16.msra.mxu1 %v2233_v31  ;;  %2100 = vmatprep.subr.bf16.mxu0 %v2284_v1 }
  0x8a   : > { %2077 = vmatmul.mubr.bf16.vlgmr.msra.gmra.mrb[12].mxu0 %v2234_v20 }
  0x8b   : > { %2101 = vmatpush3.bf16.msra.mxu0 %v2235_v34  ;;  %2097 = vmatmul.mubr.bf16.vlgmr.msra.gmra.mrb[12].mxu1 %v1267_v35 }
  0x8c   : > { %2102 = vmatprep.subr.bf16.mxu0 %v2284_v1  ;;  %2116 = vmatprep.mubr.msk.bf16.mxu0 %vm2285_vm0, %v2284_v1 }
  0x8f   : > { %2103 = vmatpush3.bf16.msra.mxu0 %v2237_v36  ;;  %v1473_v36 = vld [vmem:[%s394_s17 + $0x8] sm:$0xff] }
  0x90   : > { %2104 = vmatprep.subr.bf16.mxu0 %v2284_v1 }
  0x93   : > { %2105 = vmatpush3.bf16.msra.mxu0 %v2238_v37 }
  0x94   : > { %2106 = vmatprep.subr.bf16.mxu0 %v2284_v1 }
  0x97   : > { %2107 = vmatpush3.bf16.msra.mxu0 %v2239_v38 }
  0x98   : > { %2108 = vmatprep.subr.bf16.mxu0 %v2284_v1 }
  0x9b   : > { %2109 = vmatpush3.bf16.msra.mxu0 %v2240_v39 }
  0x9c   : > { %2110 = vmatprep.subr.bf16.mxu0 %v2284_v1 }
  0x9f   : > { %2111 = vmatpush3.bf16.msra.mxu0 %v2241_v40 }
  0xa0   : > { %2112 = vmatprep.subr.bf16.mxu0 %v2284_v1 }
  0xa3   : > { %2113 = vmatpush3.bf16.msra.mxu0 %v2242_v41 }
  0xa4   : > { %2114 = vmatprep.subr.bf16.mxu0 %v2284_v1 }
  0xa7   : > { %2115 = vmatpush3.bf16.msra.mxu0 %v2243_v42 }
  0xaa   : > { %2117 = vmatmul.mubr.bf16.vlgmr.msra.gmra.mrb[16].mxu0 %v1379_v45 }
  0xfd   : > { %v519_v47 = vpop.f32.mrb[0].mxu0 }
  0xfe   : > { %v526_v48 = vadd.f32 %v1650_v46, %v519_v47  ;;  %v1958_v49 = vpop.f32.mrb[1].mxu0  ;;  %v644_v50 = vpop.f32.mrb[0].mxu1 }
  0xff   : > { %v522_v51 = vpop.f32.mrb[2].mxu0  ;;  %v1978_v52 = vpop.f32.mrb[1].mxu1 }
 0x100   : > { %v527_v53 = vadd.f32 %v1650_v46, %v522_v51  ;;  %v651_v54 = vadd.f32 %v644_v50, %v526_v48  ;;  %v1959_v55 = vpop.f32.mrb[3].mxu0  ;;  %v647_v56 = vpop.f32.mrb[2].mxu1 }
 0x101   : > { %v1979_v57 = vpop.f32.mrb[3].mxu1 }
 0x102   : > { %v652_v1 = vadd.f32 %v647_v56, %v527_v53 }
 0x11d   : > { %v757_v58 = vpop.f32.mrb[4].mxu0 }
 0x11e   : > { %v764_v59 = vadd.f32 %v757_v58, %v651_v54  ;;  %v1998_v60 = vpop.f32.mrb[5].mxu0  ;;  %v874_v61 = vpop.f32.mrb[4].mxu1 }
 0x11f   : > { %v760_v62 = vpop.f32.mrb[6].mxu0  ;;  %v2018_v63 = vpop.f32.mrb[5].mxu1 }
 0x120   : > { %v765_v0 = vadd.f32 %v760_v62, %v652_v1  ;;  %v881_v2 = vadd.f32 %v874_v61, %v764_v59  ;;  %v1999_v3 = vpop.f32.mrb[7].mxu0  ;;  %v877_v4 = vpop.f32.mrb[6].mxu1 }
 0x121   : > { %v2019_v5 = vpop.f32.mrb[7].mxu1 }
 0x122   : > { %v882_v6 = vadd.f32 %v877_v4, %v765_v0 }
 0x13d   : > { %v998_v7 = vpop.f32.mrb[8].mxu0 }
 0x13e   : > { %v1005_v8 = vadd.f32 %v998_v7, %v881_v2  ;;  %v2038_v9 = vpop.f32.mrb[9].mxu0  ;;  %v1110_v10 = vpop.f32.mrb[8].mxu1 }
 0x13f   : > { %v1001_v11 = vpop.f32.mrb[10].mxu0  ;;  %v2058_v12 = vpop.f32.mrb[9].mxu1 }
 0x140   : > { %v1006_v13 = vadd.f32 %v1001_v11, %v882_v6  ;;  %v1117_v14 = vadd.f32 %v1110_v10, %v1005_v8  ;;  %v2039_v15 = vpop.f32.mrb[11].mxu0  ;;  %v1113_v16 = vpop.f32.mrb[10].mxu1 }
 0x141   : > { %v2059_v17 = vpop.f32.mrb[11].mxu1 }
 0x142   : > { %v1118_v18 = vadd.f32 %v1113_v16, %v1006_v13 }
 0x15d   : > { %v1227_v19 = vpop.f32.mrb[12].mxu0 }
 0x15e   : > { %v1234_v20 = vadd.f32 %v1227_v19, %v1117_v14  ;;  %v2078_v21 = vpop.f32.mrb[13].mxu0  ;;  %v1351_v22 = vpop.f32.mrb[12].mxu1 }
 0x15f   : > { %v1230_v23 = vpop.f32.mrb[14].mxu0  ;;  %v2098_v24 = vpop.f32.mrb[13].mxu1 }
 0x160   : > { %v1235_v25 = vadd.f32 %v1230_v23, %v1118_v18  ;;  %v1358_v26 = vadd.f32 %v1351_v22, %v1234_v20  ;;  %v2079_v27 = vpop.f32.mrb[15].mxu0  ;;  %v1354_v28 = vpop.f32.mrb[14].mxu1 }
 0x161   : > { %v2099_v29 = vpop.f32.mrb[15].mxu1 }
 0x162   : > { %v1359_v30 = vadd.f32 %v1354_v28, %v1235_v25 }
 0x17d   : > { %v1463_v31 = vpop.f32.mrb[16].mxu0 }
 0x17e   : > { %v1470_v33 = vadd.f32 %v1463_v31, %v1358_v26  ;;  %v2118_v34 = vpop.f32.mrb[17].mxu0 }
 0x17f   : > { %v1466_v35 = vpop.f32.mrb[18].mxu0 }
 0x180   : > { %v1474_v37 = vadd.f32 %v1472_v32, %v1470_v33  ;;  %v1471_v38 = vadd.f32 %v1466_v35, %v1359_v30  ;;  %v2119_v39 = vpop.f32.mrb[19].mxu0 }
 0x182   : > { %1476 = vst [vmem:[%s403_s29] sm:$0xff] %v1474_v37  ;;  %v1475_v40 = vadd.f32 %v1473_v36, %v1471_v38 }
 0x184   : > { %1477 = vst [vmem:[%s403_s29 + $0x8] sm:$0xff] %v1475_v40 }
 0x185 PF: > { %s16_s25 = sadd.s32 1, %s2282_s25   ;;  %s2748_s21 = smov %s2274_s23 }
 0x186   : > { %p13_p10 = scmp.ge.s32.totalorder %s16_s25, 34   ;;  %s2749_s22 = smov %s2278_s24 }
 0x187   : > { %s2750_s23 = smov %s2753_s26  ;;  %s2751_s24 = smov %s2757_s27 }
 0x188   :  { %15 = sbr.rel (!%p13_p10) target bundleno = 3 (0x3), region = 91 }

// kernel: forward.2
= control target key start
LH: loop header
LB: loop body
LE: loop exit
PB: predicated region body
PF: predicated region fallthrough
CT: control target
= control target key end

     0   :  { %s2322_s21 = smov 0   ;;  %s2324_s22 = smov 0   ;;  %s2758_s0 = inlined_call_operand.vmem [shape: bf16[2,18,18,128], index: 0, kind: input, shape index: {}, may-alias: {0,1,2}]   ;;  %s2759_s1 = inlined_call_operand.vmem [shape: bf16[2,18,18,128], index: 1, kind: input, shape index: {}, may-alias: {0,1,2}]   ;;  %s2760_s2 = inlined_call_operand.vmem [shape: bf16[2,18,18,128], index: 2, kind: input, shape index: {}, may-alias: {0,1,2}]   ;;  %s2761_s3 = inlined_call_operand.vmem [shape: bf16[3,3,128,128], index: 3, kind: input, shape index: {}]   ;;  %s2762_s4 = inlined_call_operand.vmem [shape: f32[1,128], index: 4, kind: input, shape index: {}]   ;;  %s2763_s5 = inlined_call_operand.vmem [shape: f32[1,128], index: 5, kind: input, shape index: {}]   ;;  %s2764_s6 = inlined_call_operand.vmem [shape: bf16[2,16,16,128], index: 6, kind: output, shape index: {}]  }
   0x1   :  { %s2326_s23 = smov 0   ;;  %s2328_s24 = smov 0  }
   0x2   :  { %s2330_s25 = smov 0  }
   0x3 LB: > { %s25_s26 = sadd.s32 1, %s2275_s23  ;;  %s28_s27 = sadd.s32 1, %s2279_s24  ;;  %s2283_s25 = sphi %s2330_s25, %s16_s25   ;;  %s2279_s24 = sphi %s2328_s24, %s2768_s24   ;;  %s2275_s23 = sphi %s2326_s23, %s2767_s23   ;;  %s2271_s22 = sphi %s2324_s22, %s2766_s22   ;;  %s2267_s21 = sphi %s2322_s21, %s2765_s21  }
   0x4   : > { %p26_p0 = scmp.ge.s32.totalorder %s25_s26, 16  ;;  %p1602_p1 = scmp.ge.s32.totalorder %s2283_s25, 1 }
   0x5   : > { %p272_p2 = scmp.lt.s32.totalorder %s2283_s25, 33 }
   0x6   : > { %s2770_s26 = smov (%p26_p0, %s25_s26), 0  ;;  %s2772_s27 = smov (!%p26_p0, %s28_s27), %s2279_s24 }
   0x7   : > { %p273_p3 = pnand %p1602_p1, %p272_p2  ;;  %p30_p4 = scmp.ge.s32.totalorder %s2772_s27, 2 }
   0x8   : > { %v2167_v0 = vld [vmem:[%s2761_s3] sm:$0xff] (!%p273_p3)   ;;  %v2285_v1 = vmov (!%p273_p3), 0.0   ;;  %v2169_v3 = vld [vmem:[%s2761_s3 + $0x8] sm:$0xff] (!%p273_p3)   ;;  %vm2286_vm0 = vmmov (!%p273_p3), 0   ;;  %p330_p5 = scmp.lt.s32.totalorder (!%p273_p3), %s2271_s22, 1  ;;  %p332_p6 = scmp.lt.s32.totalorder (!%p273_p3), %s2267_s21, 17 }
   0x9   : > { %s2774_s27 = smov (%p30_p4, %s2772_s27), 0  ;;  %276 = sbr.rel (%p273_p3) target bundleno = 393 (0x189), region = 44 }
   0xa   : > { %1909 = vmatprep.subr.bf16.mxu1 (!%p273_p3), %v2285_v1  ;;  %1989 = vmatprep.subr.bf16.mxu0 (!%p273_p3), %v2285_v1  ;;  %v2168_v2 = vld [vmem:[%s2761_s3 + $0x100] sm:$0xff] (!%p273_p3)   ;;  %v2170_v4 = vld [vmem:[%s2761_s3 + $0x108] sm:$0xff] (!%p273_p3)   ;;  %v2171_v5 = vld [vmem:[%s2761_s3 + $0x10] sm:$0xff] (!%p273_p3)   ;;  %s339_s19 = sadd.s32 (!%p273_p3), 1, %s2267_s21  ;;  %vm514_vm1 = vsmask.f32 (!%p273_p3), 7424 }
   0xb   : > { %1910 = vmatpush3.bf16.msra.mxu1 (!%p273_p3), %v2167_v0  ;;  %1925 = vmatprep.mubr.msk.bf16.mxu1 (!%p273_p3), %vm2286_vm0, %v2285_v1  ;;  %v2172_v6 = vld [vmem:[%s2761_s3 + $0x110] sm:$0xff] (!%p273_p3)   ;;  %p342_p7 = scmp.lt.s32.totalorder (!%p273_p3), %s339_s19, 17  ;;  %v2173_v7 = vld [vmem:[%s2761_s3 + $0x18] sm:$0xff] (!%p273_p3)   ;;  %v2175_v9 = vld [vmem:[%s2761_s3 + $0x20] sm:$0xff] (!%p273_p3)   ;;  %s350_s7 = sadd.s32 (!%p273_p3), 2, %s2267_s21  ;;  %vm636_vm2 = vcmask (!%p273_p3), 1046528  }
   0xc   : > { %1990 = vmatpush3.bf16.msra.mxu0 (!%p273_p3), %v2168_v2  ;;  %1911 = vmatprep.subr.bf16.mxu1 (!%p273_p3), %v2285_v1  ;;  %v2174_v8 = vld [vmem:[%s2761_s3 + $0x118] sm:$0xff] (!%p273_p3)   ;;  %v2176_v10 = vld [vmem:[%s2761_s3 + $0x120] sm:$0xff] (!%p273_p3)   ;;  %v2177_v11 = vld [vmem:[%s2761_s3 + $0x28] sm:$0xff] (!%p273_p3)   ;;  %p353_p8 = scmp.lt.s32.totalorder (!%p273_p3), %s350_s7, 17  ;;  %p363_p9 = scmp.lt.s32.totalorder (!%p273_p3), %s2267_s21, 15 }
   0xd   : > { %1991 = vmatprep.subr.bf16.mxu0 (!%p273_p3), %v2285_v1  ;;  %2005 = vmatprep.mubr.msk.bf16.mxu0 (!%p273_p3), %vm2286_vm0, %v2285_v1  ;;  %v2178_v12 = vld [vmem:[%s2761_s3 + $0x128] sm:$0xff] (!%p273_p3)   ;;  %v2179_v15 = vld [vmem:[%s2761_s3 + $0x30] sm:$0xff] (!%p273_p3)   ;;  %v2181_v21 = vld [vmem:[%s2761_s3 + $0x38] sm:$0xff] (!%p273_p3)  }
   0xe   : > { %v2180_v16 = vld [vmem:[%s2761_s3 + $0x130] sm:$0xff] (!%p273_p3)   ;;  %v2182_v22 = vld [vmem:[%s2761_s3 + $0x138] sm:$0xff] (!%p273_p3)   ;;  %v2184_v26 = vld [vmem:[%s2761_s3 + $0x40] sm:$0xff] (!%p273_p3)  }
   0xf   : > { %1912 = vmatpush3.bf16.msra.mxu1 (!%p273_p3), %v2169_v3  ;;  %v2187_v28 = vld [vmem:[%s2761_s3 + $0x140] sm:$0xff] (!%p273_p3)   ;;  %v2188_v29 = vld [vmem:[%s2761_s3 + $0x48] sm:$0xff] (!%p273_p3)   ;;  %v2190_v31 = vld [vmem:[%s2761_s3 + $0x50] sm:$0xff] (!%p273_p3)  }
  0x10   : > { %s2776_s22 = smov (!%p330_p5, %s2271_s22), 1  ;;  %1992 = vmatpush3.bf16.msra.mxu0 %v2170_v4  ;;  %1913 = vmatprep.subr.bf16.mxu1 %v2285_v1  ;;  %s2778_s19 = smov (!%p342_p7, %s339_s19), 17  ;;  %v2189_v30 = vld [vmem:[%s2761_s3 + $0x148] sm:$0xff]   ;;  %v2191_v32 = vld [vmem:[%s2761_s3 + $0x150] sm:$0xff]   ;;  %v2192_v33 = vld [vmem:[%s2761_s3 + $0x58] sm:$0xff]  }
  0x11   : > { %s333_s12 = scalar_select %p332_p6, %s2267_s21, 17  ;;  %1993 = vmatprep.subr.bf16.mxu0 %v2285_v1  ;;  %v2193_v34 = vld [vmem:[%s2761_s3 + $0x158] sm:$0xff]   ;;  %v2194_v35 = vld [vmem:[%s2761_s3 + $0x60] sm:$0xff]   ;;  %v2196_v39 = vld [vmem:[%s2761_s3 + $0x68] sm:$0xff]  }
  0x12   : > { %s2386_s15 = smul.u32 54, %s2776_s22  ;;  %s2780_s7 = smov (!%p353_p8, %s350_s7), 17  ;;  %v2195_v36 = vld [vmem:[%s2761_s3 + $0x160] sm:$0xff]   ;;  %v2197_v40 = vld [vmem:[%s2761_s3 + $0x168] sm:$0xff]   ;;  %v2198_v43 = vld [vmem:[%s2761_s3 + $0x70] sm:$0xff]  }
  0x13   : > { %s2121_s18 = smul.u32 3, %s333_s12  ;;  %1914 = vmatpush3.bf16.msra.mxu1 %v2171_v5  ;;  %v2199_v45 = vld [vmem:[%s2761_s3 + $0x170] sm:$0xff]   ;;  %v2200_v47 = vld [vmem:[%s2761_s3 + $0x78] sm:$0xff]   ;;  %v2203_v54 = vld [vmem:[%s2761_s3 + $0x80] sm:$0xff]   ;;  %s2782_s21 = smov (!%p363_p9, %s2267_s21), 15 }
  0x14   : > { %1994 = vmatpush3.bf16.msra.mxu0 %v2172_v6  ;;  %1915 = vmatprep.subr.bf16.mxu1 %v2285_v1  ;;  %s2123_s11 = smul.u32 3, %s2778_s19  ;;  %v2201_v50 = vld [vmem:[%s2761_s3 + $0x178] sm:$0xff]   ;;  %v2204_v56 = vld [vmem:[%s2761_s3 + $0x180] sm:$0xff]   ;;  %v2205_v58 = vld [vmem:[%s2761_s3 + $0x88] sm:$0xff]  }
  0x15   : > { %s336_s20 = sadd.s32 %s2386_s15, %s2121_s18  ;;  %1995 = vmatprep.subr.bf16.mxu0 %v2285_v1  ;;  %s2124_s28 = smul.u32 3, %s2780_s7  ;;  %v2206_v59 = vld [vmem:[%s2761_s3 + $0x188] sm:$0xff]   ;;  %v2207_v62 = vld [vmem:[%s2761_s3 + $0x90] sm:$0xff]  }
  0x16   : > { %s1603_s8 = sshll.u32 %s336_s20, 2  ;;  %s346_s18 = sadd.s32 %s2123_s11, %s2386_s15  ;;  %v2208_v2 = vld [vmem:[%s2761_s3 + $0x190] sm:$0xff]  }
  0x17   : > { %1916 = vmatpush3.bf16.msra.mxu1 %v2173_v7  ;;  %s2413_s17 = scalar_lea.vmem %s2758_s0, %s1603_s8  ;;  %s1604_s19 = sshll.u32 %s346_s18, 2  ;;  %v2209_v7 = vld [vmem:[%s2761_s3 + $0x98] sm:$0xff]  }
  0x18   : > { %1996 = vmatpush3.bf16.msra.mxu0 %v2174_v8  ;;  %1917 = vmatprep.subr.bf16.mxu1 %v2285_v1  ;;  %s348_s10 = scalar_lea.vmem %s2759_s1, %s1604_s19  ;;  %v2452_v25 = vld [vmem:[%s2413_s17] sm:$0xff]   ;;  %v2503_v37 = vld [vmem:[%s2413_s17 + $0x8] ss:$0 sps:$4 sm:$0x11]  }
  0x19   : > { %1997 = vmatprep.subr.bf16.mxu0 %v2285_v1  ;;  %v2428_v13 = vld [vmem:[%s348_s10] sm:$0xff]   ;;  %v2430_v14 = vld [vmem:[%s348_s10 + $0x8] ss:$0 sps:$4 sm:$0x11]   ;;  %s357_s10 = sadd.s32 %s2124_s28, %s2386_s15  ;;  %v518_v38 = vshll.u32 %v2452_v25, 16  ;;  %v516_v41 = vshrl.u32 %v2452_v25, 16 }
  0x1a   : > { %v870_v17 = vshrl.u32 %v2428_v13, 16  ;;  %v872_v18 = vshll.u32 %v2428_v13, 16  ;;  %v877_v19 = vshll.u32 %v2430_v14, 16  ;;  %s1605_s11 = sshll.u32 %s357_s10, 2  ;;  %v523_v44 = vshll.u32 %v2503_v37, 16  ;;  %s1607_s10 = sshll.u32 %s2776_s22, 5 }
  0x1b   : > { %1918 = vmatpush3.bf16.msra.mxu1 %v2175_v9  ;;  %s2517_s18 = scalar_lea.vmem %s2760_s2, %s1605_s11  ;;  %v520_v42 = vrot.slane %v518_v38, 1  ;;  %v990_v46 = vrot.slane %v2428_v13, 1  ;;  %v991_v51 = vrot.slane %v2430_v14, 1  ;;  %v2210_v9 = vld [vmem:[%s2761_s3 + $0x198] sm:$0xff]   ;;  %v2213_v14 = vld [vmem:[%s2761_s3 + $0xa8] sm:$0xff]  }
  0x1c   : > { %1998 = vmatpush3.bf16.msra.mxu0 %v2176_v10  ;;  %1919 = vmatprep.subr.bf16.mxu1 %v2285_v1  ;;  %v874_v20 = vrot.slane %v872_v18, 1  ;;  %v879_v24 = vrot.slane %v877_v19, 1  ;;  %v525_v49 = vrot.slane %v523_v44, 1  ;;  %v2540_v52 = vld [vmem:[%s2517_s18] sm:$0xff]   ;;  %v2217_v18 = vld [vmem:[%s2761_s3 + $0xb8] sm:$0xff]   ;;  %v637_v19 = vrot.slane %v2452_v25, 1 }
  0x1d   : > { %1999 = vmatprep.subr.bf16.mxu0 %v2285_v1  ;;  %v521_v48 = vor.u32 %v520_v42, %v516_v41  ;;  %v992_v55 = vsel %vm636_vm2, %v990_v46, %v991_v51  ;;  %v1225_v57 = vshll.u32 %v2540_v52, 16  ;;  %v1223_v60 = vshrl.u32 %v2540_v52, 16  ;;  %v2236_v63 = vld [vmem:[%s2517_s18 + $0x8] ss:$0 sps:$4 sm:$0x11]   ;;  %v2235_v38 = vld [vmem:[%s2761_s3 + $0x1f8] sm:$0xff]  }
  0x1e   : > { %v875_v23 = vor.u32 %v874_v20, %v870_v17  ;;  %v1343_v0 = vrot.slane %v2540_v52, 1  ;;  %v1230_v4 = vshll.u32 %v2236_v63, 16  ;;  %v1344_v5 = vrot.slane %v2236_v63, 1  ;;  %v2216_v17 = vld [vmem:[%s2761_s3 + $0x1b0] sm:$0xff]   ;;  %v2241_v42 = vld [vmem:[%s2761_s3 + $0x220] sm:$0xff]   ;;  %s1606_s18 = sshll.u32 %s2782_s21, 1 }
  0x1f   : > { %1920 = vmatpush3.bf16.msra.mxu1 %v2177_v11  ;;  %v526_v53 = vsel %vm514_vm1, %v521_v48, %v525_v49  ;;  %v1227_v61 = vrot.slane %v1225_v57, 1  ;;  %v2211_v11 = vld [vmem:[%s2761_s3 + $0xa0] sm:$0xff]   ;;  %v638_v20 = vrot.slane %v2503_v37, 1  ;;  %v2234_v37 = vld [vmem:[%s2761_s3 + $0xf8] sm:$0xff]   ;;  %v2239_v41 = vld [vmem:[%s2761_s3 + $0x210] sm:$0xff]   ;;  %s367_s11 = sadd.s32 %s1607_s10, %s1606_s18 }
  0x20   : > { %2000 = vmatpush3.bf16.msra.mxu0 %v2178_v12  ;;  %1921 = vmatprep.subr.bf16.mxu1 %v2285_v1  ;;  %v880_v27 = vsel %vm514_vm1, %v875_v23, %v879_v24  ;;  %v1232_v6 = vrot.slane %v1230_v4, 1  ;;  %v2580_v8 = vsel %vm636_vm2, %v1343_v0, %v1344_v5  ;;  %v2212_v12 = vld [vmem:[%s2761_s3 + $0x1a0] sm:$0xff]   ;;  %v2243_v44 = vld [vmem:[%s2761_s3 + $0x230] sm:$0xff]   ;;  %s1608_s12 = sshll.u32 %s367_s11, 2 }
  0x21   : > { %2001 = vmatprep.subr.bf16.mxu0 %v2285_v1  ;;  %v1228_v3 = vor.u32 %v1227_v61, %v1223_v60  ;;  %v2219_v23 = vld [vmem:[%s2761_s3 + $0xc0] sm:$0xff]   ;;  %s369_s13 = scalar_lea.vmem %s2764_s6, %s1608_s12 }
  0x22   : > { %v2221_v24 = vld [vmem:[%s2761_s3 + $0x1c0] sm:$0xff]  }
  0x23   : > { %1922 = vmatpush3.bf16.msra.mxu1 %v2179_v15  ;;  %v2587_v10 = vsel %vm514_vm1, %v1228_v3, %v1232_v6  ;;  %v2214_v15 = vld [vmem:[%s2761_s3 + $0x1a8] sm:$0xff]  }
  0x24   : > { %2002 = vmatpush3.bf16.msra.mxu0 %v2180_v16  ;;  %1923 = vmatprep.subr.bf16.mxu1 %v2285_v1  ;;  %v2215_v16 = vld [vmem:[%s2761_s3 + $0xb0] sm:$0xff]  }
  0x25   : > { %2003 = vmatprep.subr.bf16.mxu0 %v2285_v1 }
  0x27   : > { %1924 = vmatpush3.bf16.msra.mxu1 %v2181_v21  ;;  %v2218_v21 = vld [vmem:[%s2761_s3 + $0x1b8] sm:$0xff]  }
  0x28   : > { %2004 = vmatpush3.bf16.msra.mxu0 %v2182_v22  ;;  %1929 = vmatprep.subr.bf16.mxu1 %v2285_v1  ;;  %v639_v22 = vsel %vm636_vm2, %v637_v19, %v638_v20 }
  0x29   : > { %2009 = vmatprep.subr.bf16.mxu0 %v2285_v1 }
  0x2a   : > { %1926 = vmatmul.mubr.bf16.vlgmr.msra.gmra.mrb[0].mxu1 %v2452_v25  ;;  %v2222_v25 = vld [vmem:[%s2761_s3 + $0xc8] sm:$0xff]  }
  0x2b   : > { %1930 = vmatpush3.bf16.msra.mxu1 %v2184_v26  ;;  %2006 = vmatmul.mubr.bf16.vlgmr.msra.gmra.mrb[0].mxu0 %v880_v27  ;;  %v2223_v26 = vld [vmem:[%s2761_s3 + $0x1c8] sm:$0xff]   ;;  %v2224_v27 = vld [vmem:[%s2761_s3 + $0xd0] sm:$0xff]  }
  0x2c   : > { %2010 = vmatpush3.bf16.msra.mxu0 %v2187_v28  ;;  %1931 = vmatprep.subr.bf16.mxu1 %v2285_v1  ;;  %v2225_v28 = vld [vmem:[%s2761_s3 + $0x1d0] sm:$0xff]  }
  0x2d   : > { %2011 = vmatprep.subr.bf16.mxu0 %v2285_v1  ;;  %1945 = vmatprep.mubr.msk.bf16.mxu1 %vm2286_vm0, %v2285_v1 }
  0x2e   : > { %2025 = vmatprep.mubr.msk.bf16.mxu0 %vm2286_vm0, %v2285_v1 }
  0x2f   : > { %1932 = vmatpush3.bf16.msra.mxu1 %v2188_v29  ;;  %v2226_v29 = vld [vmem:[%s2761_s3 + $0xd8] sm:$0xff]  }
  0x30   : > { %2012 = vmatpush3.bf16.msra.mxu0 %v2189_v30  ;;  %1933 = vmatprep.subr.bf16.mxu1 %v2285_v1  ;;  %v2227_v30 = vld [vmem:[%s2761_s3 + $0x1d8] sm:$0xff]  }
  0x31   : > { %2013 = vmatprep.subr.bf16.mxu0 %v2285_v1 }
  0x33   : > { %1934 = vmatpush3.bf16.msra.mxu1 %v2190_v31  ;;  %v2228_v31 = vld [vmem:[%s2761_s3 + $0xe0] sm:$0xff]  }
  0x34   : > { %2014 = vmatpush3.bf16.msra.mxu0 %v2191_v32  ;;  %1935 = vmatprep.subr.bf16.mxu1 %v2285_v1  ;;  %v2229_v32 = vld [vmem:[%s2761_s3 + $0x1e0] sm:$0xff]  }
  0x35   : > { %2015 = vmatprep.subr.bf16.mxu0 %v2285_v1 }
  0x37   : > { %1936 = vmatpush3.bf16.msra.mxu1 %v2192_v33  ;;  %v2230_v33 = vld [vmem:[%s2761_s3 + $0xe8] sm:$0xff]  }
  0x38   : > { %2016 = vmatpush3.bf16.msra.mxu0 %v2193_v34  ;;  %1937 = vmatprep.subr.bf16.mxu1 %v2285_v1  ;;  %v2231_v34 = vld [vmem:[%s2761_s3 + $0x1e8] sm:$0xff]  }
  0x39   : > { %2017 = vmatprep.subr.bf16.mxu0 %v2285_v1 }
  0x3b   : > { %1938 = vmatpush3.bf16.msra.mxu1 %v2194_v35  ;;  %v2232_v35 = vld [vmem:[%s2761_s3 + $0xf0] sm:$0xff]  }
  0x3c   : > { %2018 = vmatpush3.bf16.msra.mxu0 %v2195_v36  ;;  %1939 = vmatprep.subr.bf16.mxu1 %v2285_v1  ;;  %v2233_v36 = vld [vmem:[%s2761_s3 + $0x1f0] sm:$0xff]  }
  0x3d   : > { %2019 = vmatprep.subr.bf16.mxu0 %v2285_v1 }
  0x3f   : > { %1940 = vmatpush3.bf16.msra.mxu1 %v2196_v39  ;;  %v2237_v39 = vld [vmem:[%s2761_s3 + $0x200] sm:$0xff]  }
  0x40   : > { %2020 = vmatpush3.bf16.msra.mxu0 %v2197_v40  ;;  %1941 = vmatprep.subr.bf16.mxu1 %v2285_v1  ;;  %v2238_v40 = vld [vmem:[%s2761_s3 + $0x208] sm:$0xff]  }
  0x41   : > { %2021 = vmatprep.subr.bf16.mxu0 %v2285_v1 }
  0x43   : > { %1942 = vmatpush3.bf16.msra.mxu1 %v2198_v43  ;;  %v2242_v43 = vld [vmem:[%s2761_s3 + $0x228] sm:$0xff]  }
  0x44   : > { %2022 = vmatpush3.bf16.msra.mxu0 %v2199_v45  ;;  %1943 = vmatprep.subr.bf16.mxu1 %v2285_v1  ;;  %v2244_v45 = vld [vmem:[%s2761_s3 + $0x238] sm:$0xff]  }
  0x45   : > { %2023 = vmatprep.subr.bf16.mxu0 %v2285_v1 }
  0x47   : > { %1944 = vmatpush3.bf16.msra.mxu1 %v2200_v47 }
  0x48   : > { %2024 = vmatpush3.bf16.msra.mxu0 %v2201_v50  ;;  %1949 = vmatprep.subr.bf16.mxu1 %v2285_v1  ;;  %v1609_v50 = vld [vmem:[%s2762_s4] ss:$0 sm:$0xff] }
  0x49   : > { %2029 = vmatprep.subr.bf16.mxu0 %v2285_v1 }
  0x4a   : > { %1946 = vmatmul.mubr.bf16.vlgmr.msra.gmra.mrb[0].mxu1 %v526_v53 }
  0x4b   : > { %1950 = vmatpush3.bf16.msra.mxu1 %v2203_v54  ;;  %2026 = vmatmul.mubr.bf16.vlgmr.msra.gmra.mrb[0].mxu0 %v992_v55 }
  0x4c   : > { %2030 = vmatpush3.bf16.msra.mxu0 %v2204_v56  ;;  %1951 = vmatprep.subr.bf16.mxu1 %v2285_v1 }
  0x4d   : > { %2031 = vmatprep.subr.bf16.mxu0 %v2285_v1  ;;  %1965 = vmatprep.mubr.msk.bf16.mxu1 %vm2286_vm0, %v2285_v1 }
  0x4e   : > { %2045 = vmatprep.mubr.msk.bf16.mxu0 %vm2286_vm0, %v2285_v1 }
  0x4f   : > { %1952 = vmatpush3.bf16.msra.mxu1 %v2205_v58 }
  0x50   : > { %2032 = vmatpush3.bf16.msra.mxu0 %v2206_v59  ;;  %1953 = vmatprep.subr.bf16.mxu1 %v2285_v1 }
  0x51   : > { %2033 = vmatprep.subr.bf16.mxu0 %v2285_v1 }
  0x53   : > { %1954 = vmatpush3.bf16.msra.mxu1 %v2207_v62 }
  0x54   : > { %2034 = vmatpush3.bf16.msra.mxu0 %v2208_v2  ;;  %1955 = vmatprep.subr.bf16.mxu1 %v2285_v1 }
  0x55   : > { %2035 = vmatprep.subr.bf16.mxu0 %v2285_v1 }
  0x57   : > { %1956 = vmatpush3.bf16.msra.mxu1 %v2209_v7 }
  0x58   : > { %2036 = vmatpush3.bf16.msra.mxu0 %v2210_v9  ;;  %1957 = vmatprep.subr.bf16.mxu1 %v2285_v1 }
  0x59   : > { %2037 = vmatprep.subr.bf16.mxu0 %v2285_v1 }
  0x5b   : > { %1958 = vmatpush3.bf16.msra.mxu1 %v2211_v11 }
  0x5c   : > { %2038 = vmatpush3.bf16.msra.mxu0 %v2212_v12  ;;  %1959 = vmatprep.subr.bf16.mxu1 %v2285_v1 }
  0x5d   : > { %2039 = vmatprep.subr.bf16.mxu0 %v2285_v1 }
  0x5f   : > { %1960 = vmatpush3.bf16.msra.mxu1 %v2213_v14 }
  0x60   : > { %2040 = vmatpush3.bf16.msra.mxu0 %v2214_v15  ;;  %1961 = vmatprep.subr.bf16.mxu1 %v2285_v1 }
  0x61   : > { %2041 = vmatprep.subr.bf16.mxu0 %v2285_v1 }
  0x63   : > { %1962 = vmatpush3.bf16.msra.mxu1 %v2215_v16 }
  0x64   : > { %2042 = vmatpush3.bf16.msra.mxu0 %v2216_v17  ;;  %1963 = vmatprep.subr.bf16.mxu1 %v2285_v1 }
  0x65   : > { %2043 = vmatprep.subr.bf16.mxu0 %v2285_v1 }
  0x67   : > { %1964 = vmatpush3.bf16.msra.mxu1 %v2217_v18 }
  0x68   : > { %2044 = vmatpush3.bf16.msra.mxu0 %v2218_v21  ;;  %1969 = vmatprep.subr.bf16.mxu1 %v2285_v1 }
  0x69   : > { %2049 = vmatprep.subr.bf16.mxu0 %v2285_v1 }
  0x6a   : > { %1966 = vmatmul.mubr.bf16.vlgmr.msra.gmra.mrb[0].mxu1 %v639_v22 }
  0x6b   : > { %1970 = vmatpush3.bf16.msra.mxu1 %v2219_v23  ;;  %2046 = vmatmul.mubr.bf16.vlgmr.msra.gmra.mrb[0].mxu0 %v2540_v52 }
  0x6c   : > { %2050 = vmatpush3.bf16.msra.mxu0 %v2221_v24  ;;  %1971 = vmatprep.subr.bf16.mxu1 %v2285_v1 }
  0x6d   : > { %2051 = vmatprep.subr.bf16.mxu0 %v2285_v1  ;;  %1985 = vmatprep.mubr.msk.bf16.mxu1 %vm2286_vm0, %v2285_v1 }
  0x6e   : > { %2065 = vmatprep.mubr.msk.bf16.mxu0 %vm2286_vm0, %v2285_v1 }
  0x6f   : > { %1972 = vmatpush3.bf16.msra.mxu1 %v2222_v25 }
  0x70   : > { %2052 = vmatpush3.bf16.msra.mxu0 %v2223_v26  ;;  %1973 = vmatprep.subr.bf16.mxu1 %v2285_v1 }
  0x71   : > { %2053 = vmatprep.subr.bf16.mxu0 %v2285_v1 }
  0x73   : > { %1974 = vmatpush3.bf16.msra.mxu1 %v2224_v27 }
  0x74   : > { %2054 = vmatpush3.bf16.msra.mxu0 %v2225_v28  ;;  %1975 = vmatprep.subr.bf16.mxu1 %v2285_v1 }
  0x75   : > { %2055 = vmatprep.subr.bf16.mxu0 %v2285_v1 }
  0x77   : > { %1976 = vmatpush3.bf16.msra.mxu1 %v2226_v29 }
  0x78   : > { %2056 = vmatpush3.bf16.msra.mxu0 %v2227_v30  ;;  %1977 = vmatprep.subr.bf16.mxu1 %v2285_v1 }
  0x79   : > { %2057 = vmatprep.subr.bf16.mxu0 %v2285_v1 }
  0x7b   : > { %1978 = vmatpush3.bf16.msra.mxu1 %v2228_v31 }
  0x7c   : > { %2058 = vmatpush3.bf16.msra.mxu0 %v2229_v32  ;;  %1979 = vmatprep.subr.bf16.mxu1 %v2285_v1 }
  0x7d   : > { %2059 = vmatprep.subr.bf16.mxu0 %v2285_v1 }
  0x7f   : > { %1980 = vmatpush3.bf16.msra.mxu1 %v2230_v33 }
  0x80   : > { %2060 = vmatpush3.bf16.msra.mxu0 %v2231_v34  ;;  %1981 = vmatprep.subr.bf16.mxu1 %v2285_v1 }
  0x81   : > { %2061 = vmatprep.subr.bf16.mxu0 %v2285_v1 }
  0x83   : > { %1982 = vmatpush3.bf16.msra.mxu1 %v2232_v35 }
  0x84   : > { %2062 = vmatpush3.bf16.msra.mxu0 %v2233_v36  ;;  %1983 = vmatprep.subr.bf16.mxu1 %v2285_v1 }
  0x85   : > { %2063 = vmatprep.subr.bf16.mxu0 %v2285_v1 }
  0x87   : > { %1984 = vmatpush3.bf16.msra.mxu1 %v2234_v37 }
  0x88   : > { %2064 = vmatpush3.bf16.msra.mxu0 %v2235_v38 }
  0x89   : > { %2069 = vmatprep.subr.bf16.mxu0 %v2285_v1 }
  0x8a   : > { %1986 = vmatmul.mubr.bf16.vlgmr.msra.gmra.mrb[0].mxu1 %v2428_v13  ;;  %v2240_v13 = vld [vmem:[%s2761_s3 + $0x218] sm:$0xff]  }
  0x8b   : > { %2066 = vmatmul.mubr.bf16.vlgmr.msra.gmra.mrb[0].mxu0 %v2587_v10 }
  0x8c   : > { %2070 = vmatpush3.bf16.msra.mxu0 %v2237_v39  ;;  %2085 = vmatprep.mubr.msk.bf16.mxu0 %vm2286_vm0, %v2285_v1 }
  0x8d   : > { %2071 = vmatprep.subr.bf16.mxu0 %v2285_v1 }
  0x90   : > { %2072 = vmatpush3.bf16.msra.mxu0 %v2238_v40 }
  0x91   : > { %2073 = vmatprep.subr.bf16.mxu0 %v2285_v1 }
  0x94   : > { %2074 = vmatpush3.bf16.msra.mxu0 %v2239_v41 }
  0x95   : > { %2075 = vmatprep.subr.bf16.mxu0 %v2285_v1 }
  0x98   : > { %2076 = vmatpush3.bf16.msra.mxu0 %v2240_v13 }
  0x99   : > { %2077 = vmatprep.subr.bf16.mxu0 %v2285_v1 }
  0x9c   : > { %2078 = vmatpush3.bf16.msra.mxu0 %v2241_v42 }
  0x9d   : > { %2079 = vmatprep.subr.bf16.mxu0 %v2285_v1 }
  0xa0   : > { %2080 = vmatpush3.bf16.msra.mxu0 %v2242_v43 }
  0xa1   : > { %2081 = vmatprep.subr.bf16.mxu0 %v2285_v1 }
  0xa4   : > { %2082 = vmatpush3.bf16.msra.mxu0 %v2243_v44 }
  0xa5   : > { %2083 = vmatprep.subr.bf16.mxu0 %v2285_v1  ;;  %v1816_v1 = vld [vmem:[%s2763_s5] ss:$0 sm:$0xff] }
  0xa8   : > { %2084 = vmatpush3.bf16.msra.mxu0 %v2244_v45 }
  0xab   : > { %2086 = vmatmul.mubr.bf16.vlgmr.msra.gmra.mrb[0].mxu0 %v2580_v8 }
 0x15d   : > { %v840_v46 = vpop.f32.mrb[0].mxu1 }
 0x15e   : > { %v1987_v47 = vpop.f32.mrb[1].mxu1  ;;  %v2089_v51 = vadd.f32 %v1609_v50, %v840_v46 }
 0x15f   : > { %v843_v48 = vpop.f32.mrb[2].mxu1 }
 0x160   : > { %v1988_v49 = vpop.f32.mrb[3].mxu1  ;;  %v2091_v53 = vadd.f32 %v1609_v50, %v843_v48 }
 0x17e   : > { %v1429_v52 = vpop.f32.mrb[0].mxu0 }
 0x17f   : > { %v2090_v54 = vadd.f32 %v2089_v51, %v1429_v52  ;;  %v2087_v55 = vpop.f32.mrb[1].mxu0 }
 0x180   : > { %v1432_v56 = vpop.f32.mrb[2].mxu0 }
 0x181   : > { %v1447_v57 = vmul.f32 %v2090_v54, %v1816_v1  ;;  %v2092_v58 = vadd.f32 %v2091_v53, %v1432_v56  ;;  %v2088_v59 = vpop.f32.mrb[3].mxu0  ;;  %vm1438_vm3 = vcmp.ge.f32.partialorder %v2090_v54, 0.0 }
 0x183   : > { %vm1439_vm4 = vcmp.ge.f32.partialorder %v2092_v58, 0.0  ;;  %v1448_v60 = vmul.f32 %v2092_v58, %v1816_v1  ;;  %v1449_v61 = vsel %vm1438_vm3, %v2090_v54, %v1447_v57 }
 0x185   : > { %v1450_v62 = vsel %vm1439_vm4, %v2092_v58, %v1448_v60 }
 0x186   : > { %v1826_v63 = vpack.c.bf16 %v1450_v62, %v1449_v61 }
 0x188   : > { %1827 = vst [vmem:[%s369_s13] sm:$0xff] %v1826_v63  }
 0x189 PF: > { %s16_s25 = sadd.s32 1, %s2283_s25   ;;  %s2765_s21 = smov %s2275_s23 }
 0x18a   : > { %p13_p10 = scmp.ge.s32.totalorder %s16_s25, 34   ;;  %s2766_s22 = smov %s2279_s24 }
 0x18b   : > { %s2767_s23 = smov %s2770_s26  ;;  %s2768_s24 = smov %s2774_s27 }
 0x18c   :  { %15 = sbr.rel (!%p13_p10) target bundleno = 3 (0x3), region = 88 }

</bundles_post_ra>
